<compile_context>
chip_gen: v7x
topology: tpu7x:2x2x1
jax: 0.10.0
libtpu: 0.0.40
codegen_flags: <defaults>
</compile_context>

<pallas_src>
import math

import jax
import jax.numpy as jnp
from jax.experimental import pallas as pl
from jax.experimental.pallas import tpu as pltpu


def _round_up(x, m):
    return ((x + m - 1) // m) * m


def _pick_unroll(t):
    for u in (8, 4, 2):
        if t % u == 0:
            return u
    return True if t <= 32 else 1


# ----------------- fused bidirectional LSTM layer (one kernel) -----------------

def _bilstm_kernel(x_ref, wih_ref, b_ref, whh_ref, out_ref,
                   gx_sc, hf_sc, cf_sc, hb_sc, cb_sc):
    """Fused bidirectional LSTM layer (both directions in one body).

    x_ref  : (Tx*Np, E) f32   flattened time-major input; Tx == T, or Tx == 1
                              for a time-constant input (decoder codes).
    wih_ref: (E, 8H)    bf16  fused input weights: cols [0:4H] fwd gates
                              (i,f,g,o order), [4H:8H] rev gates.
    b_ref  : (1, 8H)    f32   fused b_ih + b_hh for both directions.
    whh_ref: (2, H, 4H) bf16  recurrent weights (0 = fwd, 1 = rev), pre-transposed.
    out_ref: (T, Np, 2H) f32  out[t, :, 0:H] = fwd h_t, out[t, :, H:2H] = rev h_t.
    gx_sc  : (Tx*Np, 8H) f32  VMEM scratch holding the hoisted input projection.
    """
    T = out_ref.shape[0]
    Np = out_ref.shape[1]
    H = out_ref.shape[2] // 2
    H4 = 4 * H
    Tx = gx_sc.shape[0] // Np

    # Hoisted input projection for both directions: ONE MXU matmul, kept in
    # VMEM for the whole recurrence (no HBM round-trip for gx).
    gx_sc[...] = jnp.dot(x_ref[...].astype(jnp.bfloat16), wih_ref[...],
                         preferred_element_type=jnp.float32) + b_ref[...]

    hf_sc[...] = jnp.zeros_like(hf_sc)
    cf_sc[...] = jnp.zeros_like(cf_sc)
    hb_sc[...] = jnp.zeros_like(hb_sc)
    cb_sc[...] = jnp.zeros_like(cb_sc)

    whh_f = whh_ref[0]                       # (H, 4H) bf16
    whh_b = whh_ref[1]

    # Time-constant input (decoder codes): load the projection once, outside
    # the recurrence.
    if Tx == 1:
        gx_all = gx_sc[...]
        gxf_const = gx_all[:, 0:H4]
        gxb_const = gx_all[:, H4:2 * H4]

    def lstm_cell(gates, c_prev):
        # Full-width nonlinearities: 2 EUP pushes per direction per step
        # instead of 4 quarter-width ones on the serial critical path.
        sg = jax.nn.sigmoid(gates)
        th = jnp.tanh(gates)
        ig = sg[:, 0:H]
        fg = sg[:, H:2 * H]
        gg = th[:, 2 * H:3 * H]
        og = sg[:, 3 * H:4 * H]
        c = fg * c_prev + ig * gg
        h = og * jnp.tanh(c)
        return h, c

    def step(i, carry):
        tf = i                               # forward-direction timestep
        tb = T - 1 - i                       # reverse-direction timestep
        if Tx == 1:
            gxf = gxf_const
            gxb = gxb_const
        else:
            rf = pl.multiple_of(tf * Np, 8)
            rb = pl.multiple_of(tb * Np, 8)
            gxf = gx_sc[pl.ds(rf, Np), 0:H4]
            gxb = gx_sc[pl.ds(rb, Np), H4:2 * H4]
        # Two small independent matmuls (fwd / rev): the scheduler overlaps one
        # direction's gate math with the other's MXU/EUP latency.
        gates_f = gxf + jnp.dot(hf_sc[...].astype(whh_f.dtype), whh_f,
                                preferred_element_type=jnp.float32)
        gates_b = gxb + jnp.dot(hb_sc[...].astype(whh_b.dtype), whh_b,
                                preferred_element_type=jnp.float32)
        h_f, c_f = lstm_cell(gates_f, cf_sc[...])
        h_b, c_b = lstm_cell(gates_b, cb_sc[...])
        hf_sc[...] = h_f
        cf_sc[...] = c_f
        hb_sc[...] = h_b
        cb_sc[...] = c_b
        # TODO(synk): these are two H-lane masked stores per step; buffering 4
        # timesteps into a (Np, 4H) scratch would make them lane-dense.
        out_ref[tf, :, 0:H] = h_f
        out_ref[tb, :, H:2 * H] = h_b
        return carry

    jax.lax.fori_loop(0, T, step, 0, unroll=_pick_unroll(T))


def bilstm_forward(x2d, layer, *, t_out, n_pad, rnn_dim):
    """x2d: (Tx*Np, E) f32 time-major rows (Tx == t_out, or 1 for a
    time-constant input).  Returns (t_out, Np, 2H) f32."""
    txnp, e = x2d.shape
    H = rnn_dim
    h4, h8 = 4 * H, 8 * H

    # VMEM footprint (bytes): in/out blocks counted double-buffered, scratch once.
    in_bytes = txnp * e * 4 + e * h8 * 2 + h8 * 4 + 2 * H * h4 * 2
    out_bytes = t_out * n_pad * 2 * H * 4
    scratch_bytes = txnp * h8 * 4 + 4 * n_pad * max(H, 128) * 4
    need = 2 * (in_bytes + out_bytes) + scratch_bytes
    # TODO(synk): for very large t_out * n_pad this whole-T-resident layout
    # should switch to a time-chunked grid with h/c carried in scratch.
    vmem_limit = int(max(min(max(need + (4 << 20), 32 << 20), 48 << 20),
                         need + (2 << 20)))

    return pl.pallas_call(
        _bilstm_kernel,
        out_shape=jax.ShapeDtypeStruct((t_out, n_pad, 2 * H), jnp.float32),
        grid_spec=pltpu.PrefetchScalarGridSpec(
            num_scalar_prefetch=0,
            grid=(1,),
            in_specs=[
                pl.BlockSpec((txnp, e), lambda i: (0, 0)),
                pl.BlockSpec((e, h8), lambda i: (0, 0)),
                pl.BlockSpec((1, h8), lambda i: (0, 0)),
                pl.BlockSpec((2, H, h4), lambda i: (0, 0, 0)),
            ],
            out_specs=pl.BlockSpec((t_out, n_pad, 2 * H), lambda i: (0, 0, 0)),
            scratch_shapes=[
                pltpu.VMEM((txnp, h8), jnp.float32),   # gx (input projection)
                pltpu.VMEM((n_pad, H), jnp.float32),   # h fwd
                pltpu.VMEM((n_pad, H), jnp.float32),   # c fwd
                pltpu.VMEM((n_pad, H), jnp.float32),   # h rev
                pltpu.VMEM((n_pad, H), jnp.float32),   # c rev
            ],
        ),
        compiler_params=pltpu.CompilerParams(
            dimension_semantics=("arbitrary",),
            vmem_limit_bytes=vmem_limit),
    )(x2d, layer['wih_t'], layer['b'], layer['whh_t'])


# ------------------- decoder token head: Linear + log_softmax -------------------

def _linear_logsoftmax_kernel(x_ref, w_ref, b_ref, out_ref):
    logits = jnp.dot(x_ref[...], w_ref[...],
                     preferred_element_type=jnp.float32) + b_ref[...]
    m = jnp.max(logits, axis=-1, keepdims=True)
    z = logits - m
    lse = jnp.log(jnp.sum(jnp.exp(z), axis=-1, keepdims=True))
    out_ref[...] = (z - lse).astype(out_ref.dtype)


def linear_logsoftmax(x, w_t, b, v_out):
    """x: (M, K) f32; w_t: (K, Vp) bf16 (V padded to a multiple of 128, padded
    cols zero); b: (1, Vp) f32 (-1e30 in padded cols) -> (M, v_out) f32."""
    M, K = x.shape
    Vp = w_t.shape[1]

    # Weight + bias blocks have constant index maps but are still allocated
    # with 2 pipeline buffers -> count them twice.
    const_bytes = 2 * (K * Vp * 2 + 8 * Vp * 4)

    def footprint(t):
        return 2 * (t * K * 2 + t * Vp * 4) + const_bytes

    # Target ~40 MiB so the footprint also fits v7x's 64 MiB/TC physical VMEM.
    tm = min(512, _round_up(M, 8))
    while tm > 8 and footprint(tm) > (40 << 20):
        tm = max(8, _round_up(tm // 2, 8))
    Mp = _round_up(M, tm)

    xp = x
    if Mp != M:
        xp = jnp.pad(xp, ((0, Mp - M), (0, 0)))
    xp = xp.astype(jnp.bfloat16)

    fp = footprint(tm)
    # Always explicit (v5e's default scoped VMEM is only 16 MiB); capped well
    # under v7x's 64 MiB physical per-TC VMEM.
    vmem_limit = int(max(min(max(fp + (4 << 20), 32 << 20), 48 << 20),
                         fp + (2 << 20)))

    out = pl.pallas_call(
        _linear_logsoftmax_kernel,
        out_shape=jax.ShapeDtypeStruct((Mp, Vp), jnp.float32),
        grid_spec=pltpu.PrefetchScalarGridSpec(
            num_scalar_prefetch=0,
            grid=(Mp // tm,),
            in_specs=[pl.BlockSpec((tm, K), lambda i: (i, 0)),
                      pl.BlockSpec((K, Vp), lambda i: (0, 0)),
                      pl.BlockSpec((1, Vp), lambda i: (0, 0))],
            out_specs=pl.BlockSpec((tm, Vp), lambda i: (i, 0)),
        ),
        compiler_params=pltpu.CompilerParams(
            dimension_semantics=("parallel",),
            vmem_limit_bytes=vmem_limit),
    )(xp, w_t, b)
    return out[:M, :v_out]


# ----------------------------- Parameters -----------------------------

def init_params(key, *, vocab_size, tok_emb_dim, rnn_dim, num_layers,
                code_len, seqlen):
    keys = iter(jax.random.split(key, 128))

    def u(shape, scale):
        return jax.random.uniform(next(keys), shape, jnp.float32, -scale, scale)

    H = rnn_dim
    k_lstm = 1.0 / math.sqrt(H)
    k_lin = 1.0 / math.sqrt(2 * H)

    tok_emb = jax.random.normal(next(keys), (vocab_size, tok_emb_dim), jnp.float32)
    tok_emb = tok_emb.at[0].set(0.0)  # padding_idx = 0 row is zeros

    def lstm_layer(in_dim):
        # PyTorch layouts: w_ih (4H, in), w_hh (4H, H), biases (4H,); gates i,f,g,o.
        wih_f, wih_b = u((4 * H, in_dim), k_lstm), u((4 * H, in_dim), k_lstm)
        whh_f, whh_b = u((4 * H, H), k_lstm), u((4 * H, H), k_lstm)
        bif, bhf = u((4 * H,), k_lstm), u((4 * H,), k_lstm)
        bib, bhb = u((4 * H,), k_lstm), u((4 * H,), k_lstm)
        # Pre-transpose + pre-fuse at init time; matmul operands stored as bf16.
        return dict(
            wih_t=jnp.concatenate([wih_f.T, wih_b.T], axis=1).astype(jnp.bfloat16),  # (in, 8H)
            whh_t=jnp.stack([whh_f.T, whh_b.T], axis=0).astype(jnp.bfloat16),        # (2, H, 4H)
            b=jnp.concatenate([bif + bhf, bib + bhb], axis=0)[None, :],              # (1, 8H) f32
        )

    enc_lstm = [lstm_layer(tok_emb_dim if layer == 0 else 2 * H)
                for layer in range(num_layers)]
    dec_lstm = lstm_layer(code_len)   # decoder LSTM: 1 bidirectional layer

    # Vocab head: pad V to a lane-dense multiple of 128; padded columns get zero
    # weight and a -1e30 bias so they never perturb the log-softmax normalizer.
    v_pad = _round_up(vocab_size, 128)
    tok_dec_w = u((vocab_size, 2 * H), k_lin)
    tok_dec_b = u((vocab_size,), k_lin)
    w_t = jnp.zeros((2 * H, v_pad), jnp.float32).at[:, :vocab_size].set(tok_dec_w.T)
    b_p = jnp.full((v_pad,), -1e30, jnp.float32).at[:vocab_size].set(tok_dec_b)

    return dict(
        tok_emb=tok_emb,
        enc_lstm=enc_lstm,
        dec_lstm=dec_lstm,
        precoder_w_t=u((2 * code_len, 2 * H), k_lin).T,        # (2H, 2C) f32
        precoder_b=u((2 * code_len,), k_lin),
        tok_dec_w_t=w_t.astype(jnp.bfloat16),                  # (2H, Vp) bf16
        tok_dec_b=b_p[None, :],                                # (1, Vp) f32
        vocab_size=vocab_size,
        code_len=code_len,
        seqlen=seqlen,
        rnn_dim=rnn_dim,
    )


# ----------------------------- AEHasher forward -----------------------------

def ae_hasher_forward(params, toks, gumbel_key, *, training=True):
    """
    training: toks (N, T+1), returns (log-probs (seqlen, N, V), code_logits (N, code_len, 2))
    eval:     toks (N, T),   returns binary codes (N, code_len)
    """
    code_len = params['code_len']
    seqlen = params['seqlen']
    H = params['rnn_dim']
    V = params['vocab_size']

    tok_embs = params['tok_emb'][toks]                  # (N, T_tot, E) gather (glue)
    tok_embs = jnp.transpose(tok_embs, (1, 0, 2))       # (T_tot, N, E) time-major
    enc_in = tok_embs[1:] if training else tok_embs     # drop init toks when training

    T = enc_in.shape[0]
    N = toks.shape[0]
    Np = _round_up(max(N, 8), 8)                        # pad batch to >=8 sublanes
    x = jnp.pad(enc_in, ((0, 0), (0, Np - N), (0, 0)))  # (T, Np, E)

    # ---- _RNNEncoder ----
    h = x
    for layer in params['enc_lstm']:
        h = bilstm_forward(h.reshape(T * Np, h.shape[-1]), layer,
                           t_out=T, n_pad=Np, rnn_dim=H)          # (T, Np, 2H)

    h_last = h[-1, :N]                                  # (N, 2H)
    # Precoder is tiny: leave it to XLA instead of a pallas_call.
    code_embs = h_last @ params['precoder_w_t'] + params['precoder_b']
    code_embs = code_embs.reshape(N, code_len, 2)
    code_logits = jax.nn.log_softmax(code_embs, axis=2)  # tiny 2-way softmax (glue)

    # hard gumbel-softmax forward value == one-hot(argmax(logits + gumbel)); take [:, :, 0]
    u = jax.random.uniform(gumbel_key, code_logits.shape, minval=1e-20, maxval=1.0)
    g = -jnp.log(-jnp.log(u))
    y = code_logits + g
    codes = (y[:, :, 0] >= y[:, :, 1]).astype(jnp.float32)  # (N, code_len)

    if not training:
        # proj = Apply(torch.round); codes are already exactly 0/1.
        # TODO(synk): alternate proj path (num_hash_buckets != 2**code_len) not implemented.
        return codes

    # ---- _RNNDecoder ----
    # Decoder input is codes broadcast over time: time-constant input (Tx == 1),
    # so the (seqlen, N, code_len) broadcast is never materialized and its
    # input projection is computed exactly once inside the kernel.
    dec = params['dec_lstm']
    codes_p = jnp.pad(codes, ((0, Np - N), (0, 0)))                       # (Np, C)
    dec_h = bilstm_forward(codes_p, dec, t_out=seqlen, n_pad=Np, rnn_dim=H)  # (seqlen, Np, 2H)

    flat = dec_h[:, :N].reshape(seqlen * N, 2 * H)
    logp = linear_logsoftmax(flat, params['tok_dec_w_t'], params['tok_dec_b'], V)
    return logp.reshape(seqlen, N, V), code_logits


# ----------------------------- Demo -----------------------------

if __name__ == "__main__":
    N = 2            # batch
    T = 8            # sequence length (without init token)
    vocab_size = 32
    tok_emb_dim = 16
    rnn_dim = 32
    num_layers = 2
    code_len = 8
    seqlen = T + 1

    key = jax.random.PRNGKey(0)
    pkey, tkey, gkey1, gkey2 = jax.random.split(key, 4)

    params = init_params(pkey, vocab_size=vocab_size, tok_emb_dim=tok_emb_dim,
                         rnn_dim=rnn_dim, num_layers=num_layers,
                         code_len=code_len, seqlen=seqlen)

    # training mode: toks is N x (T+1); first timestep is init toks
    toks_train = jax.random.randint(tkey, (N, T + 1), 0, vocab_size)
    logp, code_logits = ae_hasher_forward(params, toks_train, gkey1, training=True)
    logp = jax.block_until_ready(logp)
    code_logits = jax.block_until_ready(code_logits)
    assert logp.shape == (seqlen, N, vocab_size)
    assert code_logits.shape == (N, code_len, 2)
    assert bool(jnp.all(jnp.isfinite(logp)))

    # eval mode: toks is N x T; returns binary codes
    toks_eval = toks_train[:, 1:]
    codes = jax.block_until_ready(
        ae_hasher_forward(params, toks_eval, gkey2, training=False))
    assert codes.shape == (N, code_len)
    assert bool(jnp.all((codes == 0.0) | (codes == 1.0)))

    print("KERNEL_OK")
</pallas_src>

<mosaic_0001>
module attributes {stable_mosaic.version = 11 : i64} {
  func.func @_bilstm_kernel(%arg0: i32, %arg1: memref<64x16xf32, #tpu.memory_space<vmem>>, %arg2: memref<16x256xbf16, #tpu.memory_space<vmem>>, %arg3: memref<1x256xf32, #tpu.memory_space<vmem>>, %arg4: memref<2x32x128xbf16, #tpu.memory_space<vmem>>, %arg5: memref<8x8x64xf32, #tpu.memory_space<vmem>>, %arg6: memref<64x256xf32, #tpu.memory_space<vmem>>, %arg7: memref<8x32xf32, #tpu.memory_space<vmem>>, %arg8: memref<8x32xf32, #tpu.memory_space<vmem>>, %arg9: memref<8x32xf32, #tpu.memory_space<vmem>>, %arg10: memref<8x32xf32, #tpu.memory_space<vmem>>) attributes {dimension_semantics = [#tpu.dimension_semantics<arbitrary>], iteration_bounds = array<i64: 1>, scalar_prefetch = 0 : i64, scratch_operands = 5 : i64, tpu.core_type = #tpu.core_type<tc>, window_params = [{pipeline_mode = #tpu.pipeline_mode<synchronous>, transform_indices = @transform_0, window_bounds = array<i64: 64, 16>}, {pipeline_mode = #tpu.pipeline_mode<synchronous>, transform_indices = @transform_1, window_bounds = array<i64: 16, 256>}, {pipeline_mode = #tpu.pipeline_mode<synchronous>, transform_indices = @transform_2, window_bounds = array<i64: 1, 256>}, {pipeline_mode = #tpu.pipeline_mode<synchronous>, transform_indices = @transform_3, window_bounds = array<i64: 2, 32, 128>}, {pipeline_mode = #tpu.pipeline_mode<synchronous>, transform_indices = @transform_4, window_bounds = array<i64: 8, 8, 64>}]} {
    %c0 = arith.constant 0 : index
    %c0_0 = arith.constant 0 : index
    %0 = vector.load %arg1[%c0, %c0_0] : memref<64x16xf32, #tpu.memory_space<vmem>>, vector<64x16xf32>
    %1 = arith.truncf %0 : vector<64x16xf32> to vector<64x16xbf16>
    %c0_1 = arith.constant 0 : index
    %c0_2 = arith.constant 0 : index
    %2 = vector.load %arg2[%c0_1, %c0_2] : memref<16x256xbf16, #tpu.memory_space<vmem>>, vector<16x256xbf16>
    %cst = arith.constant dense<0.000000e+00> : vector<64x256xf32>
    %3 = tpu.matmul %1, %2, %cst {dimension_numbers = #tpu.dot_dimension_numbers<[1], [0], [0], [1], [0, 0, 1, 1], [], []>} : vector<64x16xbf16>, vector<16x256xbf16>, vector<64x256xf32> -> vector<64x256xf32>
    %c0_3 = arith.constant 0 : index
    %c0_4 = arith.constant 0 : index
    %4 = vector.load %arg3[%c0_3, %c0_4] : memref<1x256xf32, #tpu.memory_space<vmem>>, vector<1x256xf32>
    %5 = vector.broadcast %4 : vector<1x256xf32> to vector<64x256xf32>
    %6 = arith.addf %3, %5 : vector<64x256xf32>
    %c0_5 = arith.constant 0 : index
    %c0_6 = arith.constant 0 : index
    %7 = vector.load %arg6[%c0_5, %c0_6] : memref<64x256xf32, #tpu.memory_space<vmem>>, vector<64x256xf32>
    tpu.vector_store %arg6[%c0_5, %c0_6], %6 {strides = array<i32>} : memref<64x256xf32, #tpu.memory_space<vmem>>, vector<64x256xf32>,
    %cst_7 = arith.constant 0.000000e+00 : f32
    %8 = vector.broadcast %cst_7 : f32 to vector<8x32xf32>
    %c0_8 = arith.constant 0 : index
    %c0_9 = arith.constant 0 : index
    %9 = vector.load %arg7[%c0_8, %c0_9] : memref<8x32xf32, #tpu.memory_space<vmem>>, vector<8x32xf32>
    tpu.vector_store %arg7[%c0_8, %c0_9], %8 {strides = array<i32>} : memref<8x32xf32, #tpu.memory_space<vmem>>, vector<8x32xf32>,
    %cst_10 = arith.constant 0.000000e+00 : f32
    %10 = vector.broadcast %cst_10 : f32 to vector<8x32xf32>
    %c0_11 = arith.constant 0 : index
    %c0_12 = arith.constant 0 : index
    %11 = vector.load %arg8[%c0_11, %c0_12] : memref<8x32xf32, #tpu.memory_space<vmem>>, vector<8x32xf32>
    tpu.vector_store %arg8[%c0_11, %c0_12], %10 {strides = array<i32>} : memref<8x32xf32, #tpu.memory_space<vmem>>, vector<8x32xf32>,
    %cst_13 = arith.constant 0.000000e+00 : f32
    %12 = vector.broadcast %cst_13 : f32 to vector<8x32xf32>
    %c0_14 = arith.constant 0 : index
    %c0_15 = arith.constant 0 : index
    %13 = vector.load %arg9[%c0_14, %c0_15] : memref<8x32xf32, #tpu.memory_space<vmem>>, vector<8x32xf32>
    tpu.vector_store %arg9[%c0_14, %c0_15], %12 {strides = array<i32>} : memref<8x32xf32, #tpu.memory_space<vmem>>, vector<8x32xf32>,
    %cst_16 = arith.constant 0.000000e+00 : f32
    %14 = vector.broadcast %cst_16 : f32 to vector<8x32xf32>
    %c0_17 = arith.constant 0 : index
    %c0_18 = arith.constant 0 : index
    %15 = vector.load %arg10[%c0_17, %c0_18] : memref<8x32xf32, #tpu.memory_space<vmem>>, vector<8x32xf32>
    tpu.vector_store %arg10[%c0_17, %c0_18], %14 {strides = array<i32>} : memref<8x32xf32, #tpu.memory_space<vmem>>, vector<8x32xf32>,
    %c0_19 = arith.constant 0 : index
    %c0_20 = arith.constant 0 : index
    %c0_21 = arith.constant 0 : index
    %16 = vector.load %arg4[%c0_19, %c0_20, %c0_21] : memref<2x32x128xbf16, #tpu.memory_space<vmem>>, vector<1x32x128xbf16>
    %17 = vector.shape_cast %16 : vector<1x32x128xbf16> to vector<32x128xbf16>
    %c1 = arith.constant 1 : index
    %c0_22 = arith.constant 0 : index
    %c0_23 = arith.constant 0 : index
    %18 = vector.load %arg4[%c1, %c0_22, %c0_23] : memref<2x32x128xbf16, #tpu.memory_space<vmem>>, vector<1x32x128xbf16>
    %19 = vector.shape_cast %18 : vector<1x32x128xbf16> to vector<32x128xbf16>
    %c0_i32 = arith.constant 0 : i32
    %c7_i32 = arith.constant 7 : i32
    %20 = arith.subi %c7_i32, %c0_i32 : i32
    %c8_i32 = arith.constant 8 : i32
    %21 = arith.muli %c0_i32, %c8_i32 : i32
    %22 = tpu.assume_multiple %21, 8 : i32
    %c8_i32_24 = arith.constant 8 : i32
    %23 = arith.muli %20, %c8_i32_24 : i32
    %24 = tpu.assume_multiple %23, 8 : i32
    %25 = arith.index_cast %22 : i32 to index
    %c0_25 = arith.constant 0 : index
    %26 = vector.load %arg6[%25, %c0_25] : memref<64x256xf32, #tpu.memory_space<vmem>>, vector<8x128xf32>
    %27 = arith.index_cast %24 : i32 to index
    %c128 = arith.constant 128 : index
    %28 = vector.load %arg6[%27, %c128] : memref<64x256xf32, #tpu.memory_space<vmem>>, vector<8x128xf32>
    %c0_26 = arith.constant 0 : index
    %c0_27 = arith.constant 0 : index
    %29 = vector.load %arg7[%c0_26, %c0_27] : memref<8x32xf32, #tpu.memory_space<vmem>>, vector<8x32xf32>
    %30 = arith.truncf %29 : vector<8x32xf32> to vector<8x32xbf16>
    %cst_28 = arith.constant dense<0.000000e+00> : vector<8x128xf32>
    %31 = tpu.matmul %30, %17, %cst_28 {dimension_numbers = #tpu.dot_dimension_numbers<[1], [0], [0], [1], [0, 0, 1, 1], [], []>} : vector<8x32xbf16>, vector<32x128xbf16>, vector<8x128xf32> -> vector<8x128xf32>
    %32 = arith.addf %26, %31 : vector<8x128xf32>
    %c0_29 = arith.constant 0 : index
    %c0_30 = arith.constant 0 : index
    %33 = vector.load %arg9[%c0_29, %c0_30] : memref<8x32xf32, #tpu.memory_space<vmem>>, vector<8x32xf32>
    %34 = arith.truncf %33 : vector<8x32xf32> to vector<8x32xbf16>
    %cst_31 = arith.constant dense<0.000000e+00> : vector<8x128xf32>
    %35 = tpu.matmul %34, %19, %cst_31 {dimension_numbers = #tpu.dot_dimension_numbers<[1], [0], [0], [1], [0, 0, 1, 1], [], []>} : vector<8x32xbf16>, vector<32x128xbf16>, vector<8x128xf32> -> vector<8x128xf32>
    %36 = arith.addf %28, %35 : vector<8x128xf32>
    %c0_32 = arith.constant 0 : index
    %c0_33 = arith.constant 0 : index
    %37 = vector.load %arg8[%c0_32, %c0_33] : memref<8x32xf32, #tpu.memory_space<vmem>>, vector<8x32xf32>
    %38 = arith.negf %32 : vector<8x128xf32>
    %39 = math.exp %38 : vector<8x128xf32>
    %cst_34 = arith.constant 1.000000e+00 : f32
    %40 = vector.broadcast %cst_34 : f32 to vector<8x128xf32>
    %41 = arith.addf %40, %39 : vector<8x128xf32>
    %42 = arith.divf %40, %41 : vector<8x128xf32>
    %43 = math.tanh %32 : vector<8x128xf32>
    %44 = vector.extract_strided_slice %42 {offsets = [0, 0], sizes = [8, 32], strides = [1, 1]} : vector<8x128xf32> to vector<8x32xf32>
    %45 = vector.extract_strided_slice %42 {offsets = [0, 32], sizes = [8, 32], strides = [1, 1]} : vector<8x128xf32> to vector<8x32xf32>
    %46 = vector.extract_strided_slice %43 {offsets = [0, 64], sizes = [8, 32], strides = [1, 1]} : vector<8x128xf32> to vector<8x32xf32>
    %47 = vector.extract_strided_slice %42 {offsets = [0, 96], sizes = [8, 32], strides = [1, 1]} : vector<8x128xf32> to vector<8x32xf32>
    %48 = arith.mulf %45, %37 : vector<8x32xf32>
    %49 = arith.mulf %44, %46 : vector<8x32xf32>
    %50 = arith.addf %48, %49 : vector<8x32xf32>
    %51 = math.tanh %50 : vector<8x32xf32>
    %52 = arith.mulf %47, %51 : vector<8x32xf32>
    %c0_35 = arith.constant 0 : index
    %c0_36 = arith.constant 0 : index
    %53 = vector.load %arg10[%c0_35, %c0_36] : memref<8x32xf32, #tpu.memory_space<vmem>>, vector<8x32xf32>
    %54 = arith.negf %36 : vector<8x128xf32>
    %55 = math.exp %54 : vector<8x128xf32>
    %cst_37 = arith.constant 1.000000e+00 : f32
    %56 = vector.broadcast %cst_37 : f32 to vector<8x128xf32>
    %57 = arith.addf %56, %55 : vector<8x128xf32>
    %58 = arith.divf %56, %57 : vector<8x128xf32>
    %59 = math.tanh %36 : vector<8x128xf32>
    %60 = vector.extract_strided_slice %58 {offsets = [0, 0], sizes = [8, 32], strides = [1, 1]} : vector<8x128xf32> to vector<8x32xf32>
    %61 = vector.extract_strided_slice %58 {offsets = [0, 32], sizes = [8, 32], strides = [1, 1]} : vector<8x128xf32> to vector<8x32xf32>
    %62 = vector.extract_strided_slice %59 {offsets = [0, 64], sizes = [8, 32], strides = [1, 1]} : vector<8x128xf32> to vector<8x32xf32>
    %63 = vector.extract_strided_slice %58 {offsets = [0, 96], sizes = [8, 32], strides = [1, 1]} : vector<8x128xf32> to vector<8x32xf32>
    %64 = arith.mulf %61, %53 : vector<8x32xf32>
    %65 = arith.mulf %60, %62 : vector<8x32xf32>
    %66 = arith.addf %64, %65 : vector<8x32xf32>
    %67 = math.tanh %66 : vector<8x32xf32>
    %68 = arith.mulf %63, %67 : vector<8x32xf32>
    %c0_38 = arith.constant 0 : index
    %c0_39 = arith.constant 0 : index
    %69 = vector.load %arg7[%c0_38, %c0_39] : memref<8x32xf32, #tpu.memory_space<vmem>>, vector<8x32xf32>
    tpu.vector_store %arg7[%c0_38, %c0_39], %52 {strides = array<i32>} : memref<8x32xf32, #tpu.memory_space<vmem>>, vector<8x32xf32>,
    %c0_40 = arith.constant 0 : index
    %c0_41 = arith.constant 0 : index
    %70 = vector.load %arg8[%c0_40, %c0_41] : memref<8x32xf32, #tpu.memory_space<vmem>>, vector<8x32xf32>
    tpu.vector_store %arg8[%c0_40, %c0_41], %50 {strides = array<i32>} : memref<8x32xf32, #tpu.memory_space<vmem>>, vector<8x32xf32>,
    %c0_42 = arith.constant 0 : index
    %c0_43 = arith.constant 0 : index
    %71 = vector.load %arg9[%c0_42, %c0_43] : memref<8x32xf32, #tpu.memory_space<vmem>>, vector<8x32xf32>
    tpu.vector_store %arg9[%c0_42, %c0_43], %68 {strides = array<i32>} : memref<8x32xf32, #tpu.memory_space<vmem>>, vector<8x32xf32>,
    %c0_44 = arith.constant 0 : index
    %c0_45 = arith.constant 0 : index
    %72 = vector.load %arg10[%c0_44, %c0_45] : memref<8x32xf32, #tpu.memory_space<vmem>>, vector<8x32xf32>
    tpu.vector_store %arg10[%c0_44, %c0_45], %66 {strides = array<i32>} : memref<8x32xf32, #tpu.memory_space<vmem>>, vector<8x32xf32>,
    %73 = arith.index_cast %c0_i32 : i32 to index
    %c0_46 = arith.constant 0 : index
    %c0_47 = arith.constant 0 : index
    %74 = vector.load %arg5[%73, %c0_46, %c0_47] : memref<8x8x64xf32, #tpu.memory_space<vmem>>, vector<1x8x32xf32>
    %75 = vector.shape_cast %74 : vector<1x8x32xf32> to vector<8x32xf32>
    %76 = vector.shape_cast %52 : vector<8x32xf32> to vector<1x8x32xf32>
    tpu.vector_store %arg5[%73, %c0_46, %c0_47], %76 {strides = array<i32>} : memref<8x8x64xf32, #tpu.memory_space<vmem>>, vector<1x8x32xf32>,
    %77 = arith.index_cast %20 : i32 to index
    %c0_48 = arith.constant 0 : index
    %c32 = arith.constant 32 : index
    %78 = vector.load %arg5[%77, %c0_48, %c32] : memref<8x8x64xf32, #tpu.memory_space<vmem>>, vector<1x8x32xf32>
    %79 = vector.shape_cast %78 : vector<1x8x32xf32> to vector<8x32xf32>
    %80 = vector.shape_cast %68 : vector<8x32xf32> to vector<1x8x32xf32>
    tpu.vector_store %arg5[%77, %c0_48, %c32], %80 {strides = array<i32>} : memref<8x8x64xf32, #tpu.memory_space<vmem>>, vector<1x8x32xf32>,
    %c1_i32 = arith.constant 1 : i32
    %c7_i32_49 = arith.constant 7 : i32
    %81 = arith.subi %c7_i32_49, %c1_i32 : i32
    %c8_i32_50 = arith.constant 8 : i32
    %82 = arith.muli %c1_i32, %c8_i32_50 : i32
    %83 = tpu.assume_multiple %82, 8 : i32
    %c8_i32_51 = arith.constant 8 : i32
    %84 = arith.muli %81, %c8_i32_51 : i32
    %85 = tpu.assume_multiple %84, 8 : i32
    %86 = arith.index_cast %83 : i32 to index
    %c0_52 = arith.constant 0 : index
    %87 = vector.load %arg6[%86, %c0_52] : memref<64x256xf32, #tpu.memory_space<vmem>>, vector<8x128xf32>
    %88 = arith.index_cast %85 : i32 to index
    %c128_53 = arith.constant 128 : index
    %89 = vector.load %arg6[%88, %c128_53] : memref<64x256xf32, #tpu.memory_space<vmem>>, vector<8x128xf32>
    %c0_54 = arith.constant 0 : index
    %c0_55 = arith.constant 0 : index
    %90 = vector.load %arg7[%c0_54, %c0_55] : memref<8x32xf32, #tpu.memory_space<vmem>>, vector<8x32xf32>
    %91 = arith.truncf %90 : vector<8x32xf32> to vector<8x32xbf16>
    %cst_56 = arith.constant dense<0.000000e+00> : vector<8x128xf32>
    %92 = tpu.matmul %91, %17, %cst_56 {dimension_numbers = #tpu.dot_dimension_numbers<[1], [0], [0], [1], [0, 0, 1, 1], [], []>} : vector<8x32xbf16>, vector<32x128xbf16>, vector<8x128xf32> -> vector<8x128xf32>
    %93 = arith.addf %87, %92 : vector<8x128xf32>
    %c0_57 = arith.constant 0 : index
    %c0_58 = arith.constant 0 : index
    %94 = vector.load %arg9[%c0_57, %c0_58] : memref<8x32xf32, #tpu.memory_space<vmem>>, vector<8x32xf32>
    %95 = arith.truncf %94 : vector<8x32xf32> to vector<8x32xbf16>
    %cst_59 = arith.constant dense<0.000000e+00> : vector<8x128xf32>
    %96 = tpu.matmul %95, %19, %cst_59 {dimension_numbers = #tpu.dot_dimension_numbers<[1], [0], [0], [1], [0, 0, 1, 1], [], []>} : vector<8x32xbf16>, vector<32x128xbf16>, vector<8x128xf32> -> vector<8x128xf32>
    %97 = arith.addf %89, %96 : vector<8x128xf32>
    %c0_60 = arith.constant 0 : index
    %c0_61 = arith.constant 0 : index
    %98 = vector.load %arg8[%c0_60, %c0_61] : memref<8x32xf32, #tpu.memory_space<vmem>>, vector<8x32xf32>
    %99 = arith.negf %93 : vector<8x128xf32>
    %100 = math.exp %99 : vector<8x128xf32>
    %cst_62 = arith.constant 1.000000e+00 : f32
    %101 = vector.broadcast %cst_62 : f32 to vector<8x128xf32>
    %102 = arith.addf %101, %100 : vector<8x128xf32>
    %103 = arith.divf %101, %102 : vector<8x128xf32>
    %104 = math.tanh %93 : vector<8x128xf32>
    %105 = vector.extract_strided_slice %103 {offsets = [0, 0], sizes = [8, 32], strides = [1, 1]} : vector<8x128xf32> to vector<8x32xf32>
    %106 = vector.extract_strided_slice %103 {offsets = [0, 32], sizes = [8, 32], strides = [1, 1]} : vector<8x128xf32> to vector<8x32xf32>
    %107 = vector.extract_strided_slice %104 {offsets = [0, 64], sizes = [8, 32], strides = [1, 1]} : vector<8x128xf32> to vector<8x32xf32>
    %108 = vector.extract_strided_slice %103 {offsets = [0, 96], sizes = [8, 32], strides = [1, 1]} : vector<8x128xf32> to vector<8x32xf32>
    %109 = arith.mulf %106, %98 : vector<8x32xf32>
    %110 = arith.mulf %105, %107 : vector<8x32xf32>
    %111 = arith.addf %109, %110 : vector<8x32xf32>
    %112 = math.tanh %111 : vector<8x32xf32>
    %113 = arith.mulf %108, %112 : vector<8x32xf32>
    %c0_63 = arith.constant 0 : index
    %c0_64 = arith.constant 0 : index
    %114 = vector.load %arg10[%c0_63, %c0_64] : memref<8x32xf32, #tpu.memory_space<vmem>>, vector<8x32xf32>
    %115 = arith.negf %97 : vector<8x128xf32>
    %116 = math.exp %115 : vector<8x128xf32>
    %cst_65 = arith.constant 1.000000e+00 : f32
    %117 = vector.broadcast %cst_65 : f32 to vector<8x128xf32>
    %118 = arith.addf %117, %116 : vector<8x128xf32>
    %119 = arith.divf %117, %118 : vector<8x128xf32>
    %120 = math.tanh %97 : vector<8x128xf32>
    %121 = vector.extract_strided_slice %119 {offsets = [0, 0], sizes = [8, 32], strides = [1, 1]} : vector<8x128xf32> to vector<8x32xf32>
    %122 = vector.extract_strided_slice %119 {offsets = [0, 32], sizes = [8, 32], strides = [1, 1]} : vector<8x128xf32> to vector<8x32xf32>
    %123 = vector.extract_strided_slice %120 {offsets = [0, 64], sizes = [8, 32], strides = [1, 1]} : vector<8x128xf32> to vector<8x32xf32>
    %124 = vector.extract_strided_slice %119 {offsets = [0, 96], sizes = [8, 32], strides = [1, 1]} : vector<8x128xf32> to vector<8x32xf32>
    %125 = arith.mulf %122, %114 : vector<8x32xf32>
    %126 = arith.mulf %121, %123 : vector<8x32xf32>
    %127 = arith.addf %125, %126 : vector<8x32xf32>
    %128 = math.tanh %127 : vector<8x32xf32>
    %129 = arith.mulf %124, %128 : vector<8x32xf32>
    %c0_66 = arith.constant 0 : index
    %c0_67 = arith.constant 0 : index
    %130 = vector.load %arg7[%c0_66, %c0_67] : memref<8x32xf32, #tpu.memory_space<vmem>>, vector<8x32xf32>
    tpu.vector_store %arg7[%c0_66, %c0_67], %113 {strides = array<i32>} : memref<8x32xf32, #tpu.memory_space<vmem>>, vector<8x32xf32>,
    %c0_68 = arith.constant 0 : index
    %c0_69 = arith.constant 0 : index
    %131 = vector.load %arg8[%c0_68, %c0_69] : memref<8x32xf32, #tpu.memory_space<vmem>>, vector<8x32xf32>
    tpu.vector_store %arg8[%c0_68, %c0_69], %111 {strides = array<i32>} : memref<8x32xf32, #tpu.memory_space<vmem>>, vector<8x32xf32>,
    %c0_70 = arith.constant 0 : index
    %c0_71 = arith.constant 0 : index
    %132 = vector.load %arg9[%c0_70, %c0_71] : memref<8x32xf32, #tpu.memory_space<vmem>>, vector<8x32xf32>
    tpu.vector_store %arg9[%c0_70, %c0_71], %129 {strides = array<i32>} : memref<8x32xf32, #tpu.memory_space<vmem>>, vector<8x32xf32>,
    %c0_72 = arith.constant 0 : index
    %c0_73 = arith.constant 0 : index
    %133 = vector.load %arg10[%c0_72, %c0_73] : memref<8x32xf32, #tpu.memory_space<vmem>>, vector<8x32xf32>
    tpu.vector_store %arg10[%c0_72, %c0_73], %127 {strides = array<i32>} : memref<8x32xf32, #tpu.memory_space<vmem>>, vector<8x32xf32>,
    %134 = arith.index_cast %c1_i32 : i32 to index
    %c0_74 = arith.constant 0 : index
    %c0_75 = arith.constant 0 : index
    %135 = vector.load %arg5[%134, %c0_74, %c0_75] : memref<8x8x64xf32, #tpu.memory_space<vmem>>, vector<1x8x32xf32>
    %136 = vector.shape_cast %135 : vector<1x8x32xf32> to vector<8x32xf32>
    %137 = vector.shape_cast %113 : vector<8x32xf32> to vector<1x8x32xf32>
    tpu.vector_store %arg5[%134, %c0_74, %c0_75], %137 {strides = array<i32>} : memref<8x8x64xf32, #tpu.memory_space<vmem>>, vector<1x8x32xf32>,
    %138 = arith.index_cast %81 : i32 to index
    %c0_76 = arith.constant 0 : index
    %c32_77 = arith.constant 32 : index
    %139 = vector.load %arg5[%138, %c0_76, %c32_77] : memref<8x8x64xf32, #tpu.memory_space<vmem>>, vector<1x8x32xf32>
    %140 = vector.shape_cast %139 : vector<1x8x32xf32> to vector<8x32xf32>
    %141 = vector.shape_cast %129 : vector<8x32xf32> to vector<1x8x32xf32>
    tpu.vector_store %arg5[%138, %c0_76, %c32_77], %141 {strides = array<i32>} : memref<8x8x64xf32, #tpu.memory_space<vmem>>, vector<1x8x32xf32>,
    %c2_i32 = arith.constant 2 : i32
    %c7_i32_78 = arith.constant 7 : i32
    %142 = arith.subi %c7_i32_78, %c2_i32 : i32
    %c8_i32_79 = arith.constant 8 : i32
    %143 = arith.muli %c2_i32, %c8_i32_79 : i32
    %144 = tpu.assume_multiple %143, 8 : i32
    %c8_i32_80 = arith.constant 8 : i32
    %145 = arith.muli %142, %c8_i32_80 : i32
    %146 = tpu.assume_multiple %145, 8 : i32
    %147 = arith.index_cast %144 : i32 to index
    %c0_81 = arith.constant 0 : index
    %148 = vector.load %arg6[%147, %c0_81] : memref<64x256xf32, #tpu.memory_space<vmem>>, vector<8x128xf32>
    %149 = arith.index_cast %146 : i32 to index
    %c128_82 = arith.constant 128 : index
    %150 = vector.load %arg6[%149, %c128_82] : memref<64x256xf32, #tpu.memory_space<vmem>>, vector<8x128xf32>
    %c0_83 = arith.constant 0 : index
    %c0_84 = arith.constant 0 : index
    %151 = vector.load %arg7[%c0_83, %c0_84] : memref<8x32xf32, #tpu.memory_space<vmem>>, vector<8x32xf32>
    %152 = arith.truncf %151 : vector<8x32xf32> to vector<8x32xbf16>
    %cst_85 = arith.constant dense<0.000000e+00> : vector<8x128xf32>
    %153 = tpu.matmul %152, %17, %cst_85 {dimension_numbers = #tpu.dot_dimension_numbers<[1], [0], [0], [1], [0, 0, 1, 1], [], []>} : vector<8x32xbf16>, vector<32x128xbf16>, vector<8x128xf32> -> vector<8x128xf32>
    %154 = arith.addf %148, %153 : vector<8x128xf32>
    %c0_86 = arith.constant 0 : index
    %c0_87 = arith.constant 0 : index
    %155 = vector.load %arg9[%c0_86, %c0_87] : memref<8x32xf32, #tpu.memory_space<vmem>>, vector<8x32xf32>
    %156 = arith.truncf %155 : vector<8x32xf32> to vector<8x32xbf16>
    %cst_88 = arith.constant dense<0.000000e+00> : vector<8x128xf32>
    %157 = tpu.matmul %156, %19, %cst_88 {dimension_numbers = #tpu.dot_dimension_numbers<[1], [0], [0], [1], [0, 0, 1, 1], [], []>} : vector<8x32xbf16>, vector<32x128xbf16>, vector<8x128xf32> -> vector<8x128xf32>
    %158 = arith.addf %150, %157 : vector<8x128xf32>
    %c0_89 = arith.constant 0 : index
    %c0_90 = arith.constant 0 : index
    %159 = vector.load %arg8[%c0_89, %c0_90] : memref<8x32xf32, #tpu.memory_space<vmem>>, vector<8x32xf32>
    %160 = arith.negf %154 : vector<8x128xf32>
    %161 = math.exp %160 : vector<8x128xf32>
    %cst_91 = arith.constant 1.000000e+00 : f32
    %162 = vector.broadcast %cst_91 : f32 to vector<8x128xf32>
    %163 = arith.addf %162, %161 : vector<8x128xf32>
    %164 = arith.divf %162, %163 : vector<8x128xf32>
    %165 = math.tanh %154 : vector<8x128xf32>
    %166 = vector.extract_strided_slice %164 {offsets = [0, 0], sizes = [8, 32], strides = [1, 1]} : vector<8x128xf32> to vector<8x32xf32>
    %167 = vector.extract_strided_slice %164 {offsets = [0, 32], sizes = [8, 32], strides = [1, 1]} : vector<8x128xf32> to vector<8x32xf32>
    %168 = vector.extract_strided_slice %165 {offsets = [0, 64], sizes = [8, 32], strides = [1, 1]} : vector<8x128xf32> to vector<8x32xf32>
    %169 = vector.extract_strided_slice %164 {offsets = [0, 96], sizes = [8, 32], strides = [1, 1]} : vector<8x128xf32> to vector<8x32xf32>
    %170 = arith.mulf %167, %159 : vector<8x32xf32>
    %171 = arith.mulf %166, %168 : vector<8x32xf32>
    %172 = arith.addf %170, %171 : vector<8x32xf32>
    %173 = math.tanh %172 : vector<8x32xf32>
    %174 = arith.mulf %169, %173 : vector<8x32xf32>
    %c0_92 = arith.constant 0 : index
    %c0_93 = arith.constant 0 : index
    %175 = vector.load %arg10[%c0_92, %c0_93] : memref<8x32xf32, #tpu.memory_space<vmem>>, vector<8x32xf32>
    %176 = arith.negf %158 : vector<8x128xf32>
    %177 = math.exp %176 : vector<8x128xf32>
    %cst_94 = arith.constant 1.000000e+00 : f32
    %178 = vector.broadcast %cst_94 : f32 to vector<8x128xf32>
    %179 = arith.addf %178, %177 : vector<8x128xf32>
    %180 = arith.divf %178, %179 : vector<8x128xf32>
    %181 = math.tanh %158 : vector<8x128xf32>
    %182 = vector.extract_strided_slice %180 {offsets = [0, 0], sizes = [8, 32], strides = [1, 1]} : vector<8x128xf32> to vector<8x32xf32>
    %183 = vector.extract_strided_slice %180 {offsets = [0, 32], sizes = [8, 32], strides = [1, 1]} : vector<8x128xf32> to vector<8x32xf32>
    %184 = vector.extract_strided_slice %181 {offsets = [0, 64], sizes = [8, 32], strides = [1, 1]} : vector<8x128xf32> to vector<8x32xf32>
    %185 = vector.extract_strided_slice %180 {offsets = [0, 96], sizes = [8, 32], strides = [1, 1]} : vector<8x128xf32> to vector<8x32xf32>
    %186 = arith.mulf %183, %175 : vector<8x32xf32>
    %187 = arith.mulf %182, %184 : vector<8x32xf32>
    %188 = arith.addf %186, %187 : vector<8x32xf32>
    %189 = math.tanh %188 : vector<8x32xf32>
    %190 = arith.mulf %185, %189 : vector<8x32xf32>
    %c0_95 = arith.constant 0 : index
    %c0_96 = arith.constant 0 : index
    %191 = vector.load %arg7[%c0_95, %c0_96] : memref<8x32xf32, #tpu.memory_space<vmem>>, vector<8x32xf32>
    tpu.vector_store %arg7[%c0_95, %c0_96], %174 {strides = array<i32>} : memref<8x32xf32, #tpu.memory_space<vmem>>, vector<8x32xf32>,
    %c0_97 = arith.constant 0 : index
    %c0_98 = arith.constant 0 : index
    %192 = vector.load %arg8[%c0_97, %c0_98] : memref<8x32xf32, #tpu.memory_space<vmem>>, vector<8x32xf32>
    tpu.vector_store %arg8[%c0_97, %c0_98], %172 {strides = array<i32>} : memref<8x32xf32, #tpu.memory_space<vmem>>, vector<8x32xf32>,
    %c0_99 = arith.constant 0 : index
    %c0_100 = arith.constant 0 : index
    %193 = vector.load %arg9[%c0_99, %c0_100] : memref<8x32xf32, #tpu.memory_space<vmem>>, vector<8x32xf32>
    tpu.vector_store %arg9[%c0_99, %c0_100], %190 {strides = array<i32>} : memref<8x32xf32, #tpu.memory_space<vmem>>, vector<8x32xf32>,
    %c0_101 = arith.constant 0 : index
    %c0_102 = arith.constant 0 : index
    %194 = vector.load %arg10[%c0_101, %c0_102] : memref<8x32xf32, #tpu.memory_space<vmem>>, vector<8x32xf32>
    tpu.vector_store %arg10[%c0_101, %c0_102], %188 {strides = array<i32>} : memref<8x32xf32, #tpu.memory_space<vmem>>, vector<8x32xf32>,
    %195 = arith.index_cast %c2_i32 : i32 to index
    %c0_103 = arith.constant 0 : index
    %c0_104 = arith.constant 0 : index
    %196 = vector.load %arg5[%195, %c0_103, %c0_104] : memref<8x8x64xf32, #tpu.memory_space<vmem>>, vector<1x8x32xf32>
    %197 = vector.shape_cast %196 : vector<1x8x32xf32> to vector<8x32xf32>
    %198 = vector.shape_cast %174 : vector<8x32xf32> to vector<1x8x32xf32>
    tpu.vector_store %arg5[%195, %c0_103, %c0_104], %198 {strides = array<i32>} : memref<8x8x64xf32, #tpu.memory_space<vmem>>, vector<1x8x32xf32>,
    %199 = arith.index_cast %142 : i32 to index
    %c0_105 = arith.constant 0 : index
    %c32_106 = arith.constant 32 : index
    %200 = vector.load %arg5[%199, %c0_105, %c32_106] : memref<8x8x64xf32, #tpu.memory_space<vmem>>, vector<1x8x32xf32>
    %201 = vector.shape_cast %200 : vector<1x8x32xf32> to vector<8x32xf32>
    %202 = vector.shape_cast %190 : vector<8x32xf32> to vector<1x8x32xf32>
    tpu.vector_store %arg5[%199, %c0_105, %c32_106], %202 {strides = array<i32>} : memref<8x8x64xf32, #tpu.memory_space<vmem>>, vector<1x8x32xf32>,
    %c3_i32 = arith.constant 3 : i32
    %c7_i32_107 = arith.constant 7 : i32
    %203 = arith.subi %c7_i32_107, %c3_i32 : i32
    %c8_i32_108 = arith.constant 8 : i32
    %204 = arith.muli %c3_i32, %c8_i32_108 : i32
    %205 = tpu.assume_multiple %204, 8 : i32
    %c8_i32_109 = arith.constant 8 : i32
    %206 = arith.muli %203, %c8_i32_109 : i32
    %207 = tpu.assume_multiple %206, 8 : i32
    %208 = arith.index_cast %205 : i32 to index
    %c0_110 = arith.constant 0 : index
    %209 = vector.load %arg6[%208, %c0_110] : memref<64x256xf32, #tpu.memory_space<vmem>>, vector<8x128xf32>
    %210 = arith.index_cast %207 : i32 to index
    %c128_111 = arith.constant 128 : index
    %211 = vector.load %arg6[%210, %c128_111] : memref<64x256xf32, #tpu.memory_space<vmem>>, vector<8x128xf32>
    %c0_112 = arith.constant 0 : index
    %c0_113 = arith.constant 0 : index
    %212 = vector.load %arg7[%c0_112, %c0_113] : memref<8x32xf32, #tpu.memory_space<vmem>>, vector<8x32xf32>
    %213 = arith.truncf %212 : vector<8x32xf32> to vector<8x32xbf16>
    %cst_114 = arith.constant dense<0.000000e+00> : vector<8x128xf32>
    %214 = tpu.matmul %213, %17, %cst_114 {dimension_numbers = #tpu.dot_dimension_numbers<[1], [0], [0], [1], [0, 0, 1, 1], [], []>} : vector<8x32xbf16>, vector<32x128xbf16>, vector<8x128xf32> -> vector<8x128xf32>
    %215 = arith.addf %209, %214 : vector<8x128xf32>
    %c0_115 = arith.constant 0 : index
    %c0_116 = arith.constant 0 : index
    %216 = vector.load %arg9[%c0_115, %c0_116] : memref<8x32xf32, #tpu.memory_space<vmem>>, vector<8x32xf32>
    %217 = arith.truncf %216 : vector<8x32xf32> to vector<8x32xbf16>
    %cst_117 = arith.constant dense<0.000000e+00> : vector<8x128xf32>
    %218 = tpu.matmul %217, %19, %cst_117 {dimension_numbers = #tpu.dot_dimension_numbers<[1], [0], [0], [1], [0, 0, 1, 1], [], []>} : vector<8x32xbf16>, vector<32x128xbf16>, vector<8x128xf32> -> vector<8x128xf32>
    %219 = arith.addf %211, %218 : vector<8x128xf32>
    %c0_118 = arith.constant 0 : index
    %c0_119 = arith.constant 0 : index
    %220 = vector.load %arg8[%c0_118, %c0_119] : memref<8x32xf32, #tpu.memory_space<vmem>>, vector<8x32xf32>
    %221 = arith.negf %215 : vector<8x128xf32>
    %222 = math.exp %221 : vector<8x128xf32>
    %cst_120 = arith.constant 1.000000e+00 : f32
    %223 = vector.broadcast %cst_120 : f32 to vector<8x128xf32>
    %224 = arith.addf %223, %222 : vector<8x128xf32>
    %225 = arith.divf %223, %224 : vector<8x128xf32>
    %226 = math.tanh %215 : vector<8x128xf32>
    %227 = vector.extract_strided_slice %225 {offsets = [0, 0], sizes = [8, 32], strides = [1, 1]} : vector<8x128xf32> to vector<8x32xf32>
    %228 = vector.extract_strided_slice %225 {offsets = [0, 32], sizes = [8, 32], strides = [1, 1]} : vector<8x128xf32> to vector<8x32xf32>
    %229 = vector.extract_strided_slice %226 {offsets = [0, 64], sizes = [8, 32], strides = [1, 1]} : vector<8x128xf32> to vector<8x32xf32>
    %230 = vector.extract_strided_slice %225 {offsets = [0, 96], sizes = [8, 32], strides = [1, 1]} : vector<8x128xf32> to vector<8x32xf32>
    %231 = arith.mulf %228, %220 : vector<8x32xf32>
    %232 = arith.mulf %227, %229 : vector<8x32xf32>
    %233 = arith.addf %231, %232 : vector<8x32xf32>
    %234 = math.tanh %233 : vector<8x32xf32>
    %235 = arith.mulf %230, %234 : vector<8x32xf32>
    %c0_121 = arith.constant 0 : index
    %c0_122 = arith.constant 0 : index
    %236 = vector.load %arg10[%c0_121, %c0_122] : memref<8x32xf32, #tpu.memory_space<vmem>>, vector<8x32xf32>
    %237 = arith.negf %219 : vector<8x128xf32>
    %238 = math.exp %237 : vector<8x128xf32>
    %cst_123 = arith.constant 1.000000e+00 : f32
    %239 = vector.broadcast %cst_123 : f32 to vector<8x128xf32>
    %240 = arith.addf %239, %238 : vector<8x128xf32>
    %241 = arith.divf %239, %240 : vector<8x128xf32>
    %242 = math.tanh %219 : vector<8x128xf32>
    %243 = vector.extract_strided_slice %241 {offsets = [0, 0], sizes = [8, 32], strides = [1, 1]} : vector<8x128xf32> to vector<8x32xf32>
    %244 = vector.extract_strided_slice %241 {offsets = [0, 32], sizes = [8, 32], strides = [1, 1]} : vector<8x128xf32> to vector<8x32xf32>
    %245 = vector.extract_strided_slice %242 {offsets = [0, 64], sizes = [8, 32], strides = [1, 1]} : vector<8x128xf32> to vector<8x32xf32>
    %246 = vector.extract_strided_slice %241 {offsets = [0, 96], sizes = [8, 32], strides = [1, 1]} : vector<8x128xf32> to vector<8x32xf32>
    %247 = arith.mulf %244, %236 : vector<8x32xf32>
    %248 = arith.mulf %243, %245 : vector<8x32xf32>
    %249 = arith.addf %247, %248 : vector<8x32xf32>
    %250 = math.tanh %249 : vector<8x32xf32>
    %251 = arith.mulf %246, %250 : vector<8x32xf32>
    %c0_124 = arith.constant 0 : index
    %c0_125 = arith.constant 0 : index
    %252 = vector.load %arg7[%c0_124, %c0_125] : memref<8x32xf32, #tpu.memory_space<vmem>>, vector<8x32xf32>
    tpu.vector_store %arg7[%c0_124, %c0_125], %235 {strides = array<i32>} : memref<8x32xf32, #tpu.memory_space<vmem>>, vector<8x32xf32>,
    %c0_126 = arith.constant 0 : index
    %c0_127 = arith.constant 0 : index
    %253 = vector.load %arg8[%c0_126, %c0_127] : memref<8x32xf32, #tpu.memory_space<vmem>>, vector<8x32xf32>
    tpu.vector_store %arg8[%c0_126, %c0_127], %233 {strides = array<i32>} : memref<8x32xf32, #tpu.memory_space<vmem>>, vector<8x32xf32>,
    %c0_128 = arith.constant 0 : index
    %c0_129 = arith.constant 0 : index
    %254 = vector.load %arg9[%c0_128, %c0_129] : memref<8x32xf32, #tpu.memory_space<vmem>>, vector<8x32xf32>
    tpu.vector_store %arg9[%c0_128, %c0_129], %251 {strides = array<i32>} : memref<8x32xf32, #tpu.memory_space<vmem>>, vector<8x32xf32>,
    %c0_130 = arith.constant 0 : index
    %c0_131 = arith.constant 0 : index
    %255 = vector.load %arg10[%c0_130, %c0_131] : memref<8x32xf32, #tpu.memory_space<vmem>>, vector<8x32xf32>
    tpu.vector_store %arg10[%c0_130, %c0_131], %249 {strides = array<i32>} : memref<8x32xf32, #tpu.memory_space<vmem>>, vector<8x32xf32>,
    %256 = arith.index_cast %c3_i32 : i32 to index
    %c0_132 = arith.constant 0 : index
    %c0_133 = arith.constant 0 : index
    %257 = vector.load %arg5[%256, %c0_132, %c0_133] : memref<8x8x64xf32, #tpu.memory_space<vmem>>, vector<1x8x32xf32>
    %258 = vector.shape_cast %257 : vector<1x8x32xf32> to vector<8x32xf32>
    %259 = vector.shape_cast %235 : vector<8x32xf32> to vector<1x8x32xf32>
    tpu.vector_store %arg5[%256, %c0_132, %c0_133], %259 {strides = array<i32>} : memref<8x8x64xf32, #tpu.memory_space<vmem>>, vector<1x8x32xf32>,
    %260 = arith.index_cast %203 : i32 to index
    %c0_134 = arith.constant 0 : index
    %c32_135 = arith.constant 32 : index
    %261 = vector.load %arg5[%260, %c0_134, %c32_135] : memref<8x8x64xf32, #tpu.memory_space<vmem>>, vector<1x8x32xf32>
    %262 = vector.shape_cast %261 : vector<1x8x32xf32> to vector<8x32xf32>
    %263 = vector.shape_cast %251 : vector<8x32xf32> to vector<1x8x32xf32>
    tpu.vector_store %arg5[%260, %c0_134, %c32_135], %263 {strides = array<i32>} : memref<8x8x64xf32, #tpu.memory_space<vmem>>, vector<1x8x32xf32>,
    %c4_i32 = arith.constant 4 : i32
    %c7_i32_136 = arith.constant 7 : i32
    %264 = arith.subi %c7_i32_136, %c4_i32 : i32
    %c8_i32_137 = arith.constant 8 : i32
    %265 = arith.muli %c4_i32, %c8_i32_137 : i32
    %266 = tpu.assume_multiple %265, 8 : i32
    %c8_i32_138 = arith.constant 8 : i32
    %267 = arith.muli %264, %c8_i32_138 : i32
    %268 = tpu.assume_multiple %267, 8 : i32
    %269 = arith.index_cast %266 : i32 to index
    %c0_139 = arith.constant 0 : index
    %270 = vector.load %arg6[%269, %c0_139] : memref<64x256xf32, #tpu.memory_space<vmem>>, vector<8x128xf32>
    %271 = arith.index_cast %268 : i32 to index
    %c128_140 = arith.constant 128 : index
    %272 = vector.load %arg6[%271, %c128_140] : memref<64x256xf32, #tpu.memory_space<vmem>>, vector<8x128xf32>
    %c0_141 = arith.constant 0 : index
    %c0_142 = arith.constant 0 : index
    %273 = vector.load %arg7[%c0_141, %c0_142] : memref<8x32xf32, #tpu.memory_space<vmem>>, vector<8x32xf32>
    %274 = arith.truncf %273 : vector<8x32xf32> to vector<8x32xbf16>
    %cst_143 = arith.constant dense<0.000000e+00> : vector<8x128xf32>
    %275 = tpu.matmul %274, %17, %cst_143 {dimension_numbers = #tpu.dot_dimension_numbers<[1], [0], [0], [1], [0, 0, 1, 1], [], []>} : vector<8x32xbf16>, vector<32x128xbf16>, vector<8x128xf32> -> vector<8x128xf32>
    %276 = arith.addf %270, %275 : vector<8x128xf32>
    %c0_144 = arith.constant 0 : index
    %c0_145 = arith.constant 0 : index
    %277 = vector.load %arg9[%c0_144, %c0_145] : memref<8x32xf32, #tpu.memory_space<vmem>>, vector<8x32xf32>
    %278 = arith.truncf %277 : vector<8x32xf32> to vector<8x32xbf16>
    %cst_146 = arith.constant dense<0.000000e+00> : vector<8x128xf32>
    %279 = tpu.matmul %278, %19, %cst_146 {dimension_numbers = #tpu.dot_dimension_numbers<[1], [0], [0], [1], [0, 0, 1, 1], [], []>} : vector<8x32xbf16>, vector<32x128xbf16>, vector<8x128xf32> -> vector<8x128xf32>
    %280 = arith.addf %272, %279 : vector<8x128xf32>
    %c0_147 = arith.constant 0 : index
    %c0_148 = arith.constant 0 : index
    %281 = vector.load %arg8[%c0_147, %c0_148] : memref<8x32xf32, #tpu.memory_space<vmem>>, vector<8x32xf32>
    %282 = arith.negf %276 : vector<8x128xf32>
    %283 = math.exp %282 : vector<8x128xf32>
    %cst_149 = arith.constant 1.000000e+00 : f32
    %284 = vector.broadcast %cst_149 : f32 to vector<8x128xf32>
    %285 = arith.addf %284, %283 : vector<8x128xf32>
    %286 = arith.divf %284, %285 : vector<8x128xf32>
    %287 = math.tanh %276 : vector<8x128xf32>
    %288 = vector.extract_strided_slice %286 {offsets = [0, 0], sizes = [8, 32], strides = [1, 1]} : vector<8x128xf32> to vector<8x32xf32>
    %289 = vector.extract_strided_slice %286 {offsets = [0, 32], sizes = [8, 32], strides = [1, 1]} : vector<8x128xf32> to vector<8x32xf32>
    %290 = vector.extract_strided_slice %287 {offsets = [0, 64], sizes = [8, 32], strides = [1, 1]} : vector<8x128xf32> to vector<8x32xf32>
    %291 = vector.extract_strided_slice %286 {offsets = [0, 96], sizes = [8, 32], strides = [1, 1]} : vector<8x128xf32> to vector<8x32xf32>
    %292 = arith.mulf %289, %281 : vector<8x32xf32>
    %293 = arith.mulf %288, %290 : vector<8x32xf32>
    %294 = arith.addf %292, %293 : vector<8x32xf32>
    %295 = math.tanh %294 : vector<8x32xf32>
    %296 = arith.mulf %291, %295 : vector<8x32xf32>
    %c0_150 = arith.constant 0 : index
    %c0_151 = arith.constant 0 : index
    %297 = vector.load %arg10[%c0_150, %c0_151] : memref<8x32xf32, #tpu.memory_space<vmem>>, vector<8x32xf32>
    %298 = arith.negf %280 : vector<8x128xf32>
    %299 = math.exp %298 : vector<8x128xf32>
    %cst_152 = arith.constant 1.000000e+00 : f32
    %300 = vector.broadcast %cst_152 : f32 to vector<8x128xf32>
    %301 = arith.addf %300, %299 : vector<8x128xf32>
    %302 = arith.divf %300, %301 : vector<8x128xf32>
    %303 = math.tanh %280 : vector<8x128xf32>
    %304 = vector.extract_strided_slice %302 {offsets = [0, 0], sizes = [8, 32], strides = [1, 1]} : vector<8x128xf32> to vector<8x32xf32>
    %305 = vector.extract_strided_slice %302 {offsets = [0, 32], sizes = [8, 32], strides = [1, 1]} : vector<8x128xf32> to vector<8x32xf32>
    %306 = vector.extract_strided_slice %303 {offsets = [0, 64], sizes = [8, 32], strides = [1, 1]} : vector<8x128xf32> to vector<8x32xf32>
    %307 = vector.extract_strided_slice %302 {offsets = [0, 96], sizes = [8, 32], strides = [1, 1]} : vector<8x128xf32> to vector<8x32xf32>
    %308 = arith.mulf %305, %297 : vector<8x32xf32>
    %309 = arith.mulf %304, %306 : vector<8x32xf32>
    %310 = arith.addf %308, %309 : vector<8x32xf32>
    %311 = math.tanh %310 : vector<8x32xf32>
    %312 = arith.mulf %307, %311 : vector<8x32xf32>
    %c0_153 = arith.constant 0 : index
    %c0_154 = arith.constant 0 : index
    %313 = vector.load %arg7[%c0_153, %c0_154] : memref<8x32xf32, #tpu.memory_space<vmem>>, vector<8x32xf32>
    tpu.vector_store %arg7[%c0_153, %c0_154], %296 {strides = array<i32>} : memref<8x32xf32, #tpu.memory_space<vmem>>, vector<8x32xf32>,
    %c0_155 = arith.constant 0 : index
    %c0_156 = arith.constant 0 : index
    %314 = vector.load %arg8[%c0_155, %c0_156] : memref<8x32xf32, #tpu.memory_space<vmem>>, vector<8x32xf32>
    tpu.vector_store %arg8[%c0_155, %c0_156], %294 {strides = array<i32>} : memref<8x32xf32, #tpu.memory_space<vmem>>, vector<8x32xf32>,
    %c0_157 = arith.constant 0 : index
    %c0_158 = arith.constant 0 : index
    %315 = vector.load %arg9[%c0_157, %c0_158] : memref<8x32xf32, #tpu.memory_space<vmem>>, vector<8x32xf32>
    tpu.vector_store %arg9[%c0_157, %c0_158], %312 {strides = array<i32>} : memref<8x32xf32, #tpu.memory_space<vmem>>, vector<8x32xf32>,
    %c0_159 = arith.constant 0 : index
    %c0_160 = arith.constant 0 : index
    %316 = vector.load %arg10[%c0_159, %c0_160] : memref<8x32xf32, #tpu.memory_space<vmem>>, vector<8x32xf32>
    tpu.vector_store %arg10[%c0_159, %c0_160], %310 {strides = array<i32>} : memref<8x32xf32, #tpu.memory_space<vmem>>, vector<8x32xf32>,
    %317 = arith.index_cast %c4_i32 : i32 to index
    %c0_161 = arith.constant 0 : index
    %c0_162 = arith.constant 0 : index
    %318 = vector.load %arg5[%317, %c0_161, %c0_162] : memref<8x8x64xf32, #tpu.memory_space<vmem>>, vector<1x8x32xf32>
    %319 = vector.shape_cast %318 : vector<1x8x32xf32> to vector<8x32xf32>
    %320 = vector.shape_cast %296 : vector<8x32xf32> to vector<1x8x32xf32>
    tpu.vector_store %arg5[%317, %c0_161, %c0_162], %320 {strides = array<i32>} : memref<8x8x64xf32, #tpu.memory_space<vmem>>, vector<1x8x32xf32>,
    %321 = arith.index_cast %264 : i32 to index
    %c0_163 = arith.constant 0 : index
    %c32_164 = arith.constant 32 : index
    %322 = vector.load %arg5[%321, %c0_163, %c32_164] : memref<8x8x64xf32, #tpu.memory_space<vmem>>, vector<1x8x32xf32>
    %323 = vector.shape_cast %322 : vector<1x8x32xf32> to vector<8x32xf32>
    %324 = vector.shape_cast %312 : vector<8x32xf32> to vector<1x8x32xf32>
    tpu.vector_store %arg5[%321, %c0_163, %c32_164], %324 {strides = array<i32>} : memref<8x8x64xf32, #tpu.memory_space<vmem>>, vector<1x8x32xf32>,
    %c5_i32 = arith.constant 5 : i32
    %c7_i32_165 = arith.constant 7 : i32
    %325 = arith.subi %c7_i32_165, %c5_i32 : i32
    %c8_i32_166 = arith.constant 8 : i32
    %326 = arith.muli %c5_i32, %c8_i32_166 : i32
    %327 = tpu.assume_multiple %326, 8 : i32
    %c8_i32_167 = arith.constant 8 : i32
    %328 = arith.muli %325, %c8_i32_167 : i32
    %329 = tpu.assume_multiple %328, 8 : i32
    %330 = arith.index_cast %327 : i32 to index
    %c0_168 = arith.constant 0 : index
    %331 = vector.load %arg6[%330, %c0_168] : memref<64x256xf32, #tpu.memory_space<vmem>>, vector<8x128xf32>
    %332 = arith.index_cast %329 : i32 to index
    %c128_169 = arith.constant 128 : index
    %333 = vector.load %arg6[%332, %c128_169] : memref<64x256xf32, #tpu.memory_space<vmem>>, vector<8x128xf32>
    %c0_170 = arith.constant 0 : index
    %c0_171 = arith.constant 0 : index
    %334 = vector.load %arg7[%c0_170, %c0_171] : memref<8x32xf32, #tpu.memory_space<vmem>>, vector<8x32xf32>
    %335 = arith.truncf %334 : vector<8x32xf32> to vector<8x32xbf16>
    %cst_172 = arith.constant dense<0.000000e+00> : vector<8x128xf32>
    %336 = tpu.matmul %335, %17, %cst_172 {dimension_numbers = #tpu.dot_dimension_numbers<[1], [0], [0], [1], [0, 0, 1, 1], [], []>} : vector<8x32xbf16>, vector<32x128xbf16>, vector<8x128xf32> -> vector<8x128xf32>
    %337 = arith.addf %331, %336 : vector<8x128xf32>
    %c0_173 = arith.constant 0 : index
    %c0_174 = arith.constant 0 : index
    %338 = vector.load %arg9[%c0_173, %c0_174] : memref<8x32xf32, #tpu.memory_space<vmem>>, vector<8x32xf32>
    %339 = arith.truncf %338 : vector<8x32xf32> to vector<8x32xbf16>
    %cst_175 = arith.constant dense<0.000000e+00> : vector<8x128xf32>
    %340 = tpu.matmul %339, %19, %cst_175 {dimension_numbers = #tpu.dot_dimension_numbers<[1], [0], [0], [1], [0, 0, 1, 1], [], []>} : vector<8x32xbf16>, vector<32x128xbf16>, vector<8x128xf32> -> vector<8x128xf32>
    %341 = arith.addf %333, %340 : vector<8x128xf32>
    %c0_176 = arith.constant 0 : index
    %c0_177 = arith.constant 0 : index
    %342 = vector.load %arg8[%c0_176, %c0_177] : memref<8x32xf32, #tpu.memory_space<vmem>>, vector<8x32xf32>
    %343 = arith.negf %337 : vector<8x128xf32>
    %344 = math.exp %343 : vector<8x128xf32>
    %cst_178 = arith.constant 1.000000e+00 : f32
    %345 = vector.broadcast %cst_178 : f32 to vector<8x128xf32>
    %346 = arith.addf %345, %344 : vector<8x128xf32>
    %347 = arith.divf %345, %346 : vector<8x128xf32>
    %348 = math.tanh %337 : vector<8x128xf32>
    %349 = vector.extract_strided_slice %347 {offsets = [0, 0], sizes = [8, 32], strides = [1, 1]} : vector<8x128xf32> to vector<8x32xf32>
    %350 = vector.extract_strided_slice %347 {offsets = [0, 32], sizes = [8, 32], strides = [1, 1]} : vector<8x128xf32> to vector<8x32xf32>
    %351 = vector.extract_strided_slice %348 {offsets = [0, 64], sizes = [8, 32], strides = [1, 1]} : vector<8x128xf32> to vector<8x32xf32>
    %352 = vector.extract_strided_slice %347 {offsets = [0, 96], sizes = [8, 32], strides = [1, 1]} : vector<8x128xf32> to vector<8x32xf32>
    %353 = arith.mulf %350, %342 : vector<8x32xf32>
    %354 = arith.mulf %349, %351 : vector<8x32xf32>
    %355 = arith.addf %353, %354 : vector<8x32xf32>
    %356 = math.tanh %355 : vector<8x32xf32>
    %357 = arith.mulf %352, %356 : vector<8x32xf32>
    %c0_179 = arith.constant 0 : index
    %c0_180 = arith.constant 0 : index
    %358 = vector.load %arg10[%c0_179, %c0_180] : memref<8x32xf32, #tpu.memory_space<vmem>>, vector<8x32xf32>
    %359 = arith.negf %341 : vector<8x128xf32>
    %360 = math.exp %359 : vector<8x128xf32>
    %cst_181 = arith.constant 1.000000e+00 : f32
    %361 = vector.broadcast %cst_181 : f32 to vector<8x128xf32>
    %362 = arith.addf %361, %360 : vector<8x128xf32>
    %363 = arith.divf %361, %362 : vector<8x128xf32>
    %364 = math.tanh %341 : vector<8x128xf32>
    %365 = vector.extract_strided_slice %363 {offsets = [0, 0], sizes = [8, 32], strides = [1, 1]} : vector<8x128xf32> to vector<8x32xf32>
    %366 = vector.extract_strided_slice %363 {offsets = [0, 32], sizes = [8, 32], strides = [1, 1]} : vector<8x128xf32> to vector<8x32xf32>
    %367 = vector.extract_strided_slice %364 {offsets = [0, 64], sizes = [8, 32], strides = [1, 1]} : vector<8x128xf32> to vector<8x32xf32>
    %368 = vector.extract_strided_slice %363 {offsets = [0, 96], sizes = [8, 32], strides = [1, 1]} : vector<8x128xf32> to vector<8x32xf32>
    %369 = arith.mulf %366, %358 : vector<8x32xf32>
    %370 = arith.mulf %365, %367 : vector<8x32xf32>
    %371 = arith.addf %369, %370 : vector<8x32xf32>
    %372 = math.tanh %371 : vector<8x32xf32>
    %373 = arith.mulf %368, %372 : vector<8x32xf32>
    %c0_182 = arith.constant 0 : index
    %c0_183 = arith.constant 0 : index
    %374 = vector.load %arg7[%c0_182, %c0_183] : memref<8x32xf32, #tpu.memory_space<vmem>>, vector<8x32xf32>
    tpu.vector_store %arg7[%c0_182, %c0_183], %357 {strides = array<i32>} : memref<8x32xf32, #tpu.memory_space<vmem>>, vector<8x32xf32>,
    %c0_184 = arith.constant 0 : index
    %c0_185 = arith.constant 0 : index
    %375 = vector.load %arg8[%c0_184, %c0_185] : memref<8x32xf32, #tpu.memory_space<vmem>>, vector<8x32xf32>
    tpu.vector_store %arg8[%c0_184, %c0_185], %355 {strides = array<i32>} : memref<8x32xf32, #tpu.memory_space<vmem>>, vector<8x32xf32>,
    %c0_186 = arith.constant 0 : index
    %c0_187 = arith.constant 0 : index
    %376 = vector.load %arg9[%c0_186, %c0_187] : memref<8x32xf32, #tpu.memory_space<vmem>>, vector<8x32xf32>
    tpu.vector_store %arg9[%c0_186, %c0_187], %373 {strides = array<i32>} : memref<8x32xf32, #tpu.memory_space<vmem>>, vector<8x32xf32>,
    %c0_188 = arith.constant 0 : index
    %c0_189 = arith.constant 0 : index
    %377 = vector.load %arg10[%c0_188, %c0_189] : memref<8x32xf32, #tpu.memory_space<vmem>>, vector<8x32xf32>
    tpu.vector_store %arg10[%c0_188, %c0_189], %371 {strides = array<i32>} : memref<8x32xf32, #tpu.memory_space<vmem>>, vector<8x32xf32>,
    %378 = arith.index_cast %c5_i32 : i32 to index
    %c0_190 = arith.constant 0 : index
    %c0_191 = arith.constant 0 : index
    %379 = vector.load %arg5[%378, %c0_190, %c0_191] : memref<8x8x64xf32, #tpu.memory_space<vmem>>, vector<1x8x32xf32>
    %380 = vector.shape_cast %379 : vector<1x8x32xf32> to vector<8x32xf32>
    %381 = vector.shape_cast %357 : vector<8x32xf32> to vector<1x8x32xf32>
    tpu.vector_store %arg5[%378, %c0_190, %c0_191], %381 {strides = array<i32>} : memref<8x8x64xf32, #tpu.memory_space<vmem>>, vector<1x8x32xf32>,
    %382 = arith.index_cast %325 : i32 to index
    %c0_192 = arith.constant 0 : index
    %c32_193 = arith.constant 32 : index
    %383 = vector.load %arg5[%382, %c0_192, %c32_193] : memref<8x8x64xf32, #tpu.memory_space<vmem>>, vector<1x8x32xf32>
    %384 = vector.shape_cast %383 : vector<1x8x32xf32> to vector<8x32xf32>
    %385 = vector.shape_cast %373 : vector<8x32xf32> to vector<1x8x32xf32>
    tpu.vector_store %arg5[%382, %c0_192, %c32_193], %385 {strides = array<i32>} : memref<8x8x64xf32, #tpu.memory_space<vmem>>, vector<1x8x32xf32>,
    %c6_i32 = arith.constant 6 : i32
    %c7_i32_194 = arith.constant 7 : i32
    %386 = arith.subi %c7_i32_194, %c6_i32 : i32
    %c8_i32_195 = arith.constant 8 : i32
    %387 = arith.muli %c6_i32, %c8_i32_195 : i32
    %388 = tpu.assume_multiple %387, 8 : i32
    %c8_i32_196 = arith.constant 8 : i32
    %389 = arith.muli %386, %c8_i32_196 : i32
    %390 = tpu.assume_multiple %389, 8 : i32
    %391 = arith.index_cast %388 : i32 to index
    %c0_197 = arith.constant 0 : index
    %392 = vector.load %arg6[%391, %c0_197] : memref<64x256xf32, #tpu.memory_space<vmem>>, vector<8x128xf32>
    %393 = arith.index_cast %390 : i32 to index
    %c128_198 = arith.constant 128 : index
    %394 = vector.load %arg6[%393, %c128_198] : memref<64x256xf32, #tpu.memory_space<vmem>>, vector<8x128xf32>
    %c0_199 = arith.constant 0 : index
    %c0_200 = arith.constant 0 : index
    %395 = vector.load %arg7[%c0_199, %c0_200] : memref<8x32xf32, #tpu.memory_space<vmem>>, vector<8x32xf32>
    %396 = arith.truncf %395 : vector<8x32xf32> to vector<8x32xbf16>
    %cst_201 = arith.constant dense<0.000000e+00> : vector<8x128xf32>
    %397 = tpu.matmul %396, %17, %cst_201 {dimension_numbers = #tpu.dot_dimension_numbers<[1], [0], [0], [1], [0, 0, 1, 1], [], []>} : vector<8x32xbf16>, vector<32x128xbf16>, vector<8x128xf32> -> vector<8x128xf32>
    %398 = arith.addf %392, %397 : vector<8x128xf32>
    %c0_202 = arith.constant 0 : index
    %c0_203 = arith.constant 0 : index
    %399 = vector.load %arg9[%c0_202, %c0_203] : memref<8x32xf32, #tpu.memory_space<vmem>>, vector<8x32xf32>
    %400 = arith.truncf %399 : vector<8x32xf32> to vector<8x32xbf16>
    %cst_204 = arith.constant dense<0.000000e+00> : vector<8x128xf32>
    %401 = tpu.matmul %400, %19, %cst_204 {dimension_numbers = #tpu.dot_dimension_numbers<[1], [0], [0], [1], [0, 0, 1, 1], [], []>} : vector<8x32xbf16>, vector<32x128xbf16>, vector<8x128xf32> -> vector<8x128xf32>
    %402 = arith.addf %394, %401 : vector<8x128xf32>
    %c0_205 = arith.constant 0 : index
    %c0_206 = arith.constant 0 : index
    %403 = vector.load %arg8[%c0_205, %c0_206] : memref<8x32xf32, #tpu.memory_space<vmem>>, vector<8x32xf32>
    %404 = arith.negf %398 : vector<8x128xf32>
    %405 = math.exp %404 : vector<8x128xf32>
    %cst_207 = arith.constant 1.000000e+00 : f32
    %406 = vector.broadcast %cst_207 : f32 to vector<8x128xf32>
    %407 = arith.addf %406, %405 : vector<8x128xf32>
    %408 = arith.divf %406, %407 : vector<8x128xf32>
    %409 = math.tanh %398 : vector<8x128xf32>
    %410 = vector.extract_strided_slice %408 {offsets = [0, 0], sizes = [8, 32], strides = [1, 1]} : vector<8x128xf32> to vector<8x32xf32>
    %411 = vector.extract_strided_slice %408 {offsets = [0, 32], sizes = [8, 32], strides = [1, 1]} : vector<8x128xf32> to vector<8x32xf32>
    %412 = vector.extract_strided_slice %409 {offsets = [0, 64], sizes = [8, 32], strides = [1, 1]} : vector<8x128xf32> to vector<8x32xf32>
    %413 = vector.extract_strided_slice %408 {offsets = [0, 96], sizes = [8, 32], strides = [1, 1]} : vector<8x128xf32> to vector<8x32xf32>
    %414 = arith.mulf %411, %403 : vector<8x32xf32>
    %415 = arith.mulf %410, %412 : vector<8x32xf32>
    %416 = arith.addf %414, %415 : vector<8x32xf32>
    %417 = math.tanh %416 : vector<8x32xf32>
    %418 = arith.mulf %413, %417 : vector<8x32xf32>
    %c0_208 = arith.constant 0 : index
    %c0_209 = arith.constant 0 : index
    %419 = vector.load %arg10[%c0_208, %c0_209] : memref<8x32xf32, #tpu.memory_space<vmem>>, vector<8x32xf32>
    %420 = arith.negf %402 : vector<8x128xf32>
    %421 = math.exp %420 : vector<8x128xf32>
    %cst_210 = arith.constant 1.000000e+00 : f32
    %422 = vector.broadcast %cst_210 : f32 to vector<8x128xf32>
    %423 = arith.addf %422, %421 : vector<8x128xf32>
    %424 = arith.divf %422, %423 : vector<8x128xf32>
    %425 = math.tanh %402 : vector<8x128xf32>
    %426 = vector.extract_strided_slice %424 {offsets = [0, 0], sizes = [8, 32], strides = [1, 1]} : vector<8x128xf32> to vector<8x32xf32>
    %427 = vector.extract_strided_slice %424 {offsets = [0, 32], sizes = [8, 32], strides = [1, 1]} : vector<8x128xf32> to vector<8x32xf32>
    %428 = vector.extract_strided_slice %425 {offsets = [0, 64], sizes = [8, 32], strides = [1, 1]} : vector<8x128xf32> to vector<8x32xf32>
    %429 = vector.extract_strided_slice %424 {offsets = [0, 96], sizes = [8, 32], strides = [1, 1]} : vector<8x128xf32> to vector<8x32xf32>
    %430 = arith.mulf %427, %419 : vector<8x32xf32>
    %431 = arith.mulf %426, %428 : vector<8x32xf32>
    %432 = arith.addf %430, %431 : vector<8x32xf32>
    %433 = math.tanh %432 : vector<8x32xf32>
    %434 = arith.mulf %429, %433 : vector<8x32xf32>
    %c0_211 = arith.constant 0 : index
    %c0_212 = arith.constant 0 : index
    %435 = vector.load %arg7[%c0_211, %c0_212] : memref<8x32xf32, #tpu.memory_space<vmem>>, vector<8x32xf32>
    tpu.vector_store %arg7[%c0_211, %c0_212], %418 {strides = array<i32>} : memref<8x32xf32, #tpu.memory_space<vmem>>, vector<8x32xf32>,
    %c0_213 = arith.constant 0 : index
    %c0_214 = arith.constant 0 : index
    %436 = vector.load %arg8[%c0_213, %c0_214] : memref<8x32xf32, #tpu.memory_space<vmem>>, vector<8x32xf32>
    tpu.vector_store %arg8[%c0_213, %c0_214], %416 {strides = array<i32>} : memref<8x32xf32, #tpu.memory_space<vmem>>, vector<8x32xf32>,
    %c0_215 = arith.constant 0 : index
    %c0_216 = arith.constant 0 : index
    %437 = vector.load %arg9[%c0_215, %c0_216] : memref<8x32xf32, #tpu.memory_space<vmem>>, vector<8x32xf32>
    tpu.vector_store %arg9[%c0_215, %c0_216], %434 {strides = array<i32>} : memref<8x32xf32, #tpu.memory_space<vmem>>, vector<8x32xf32>,
    %c0_217 = arith.constant 0 : index
    %c0_218 = arith.constant 0 : index
    %438 = vector.load %arg10[%c0_217, %c0_218] : memref<8x32xf32, #tpu.memory_space<vmem>>, vector<8x32xf32>
    tpu.vector_store %arg10[%c0_217, %c0_218], %432 {strides = array<i32>} : memref<8x32xf32, #tpu.memory_space<vmem>>, vector<8x32xf32>,
    %439 = arith.index_cast %c6_i32 : i32 to index
    %c0_219 = arith.constant 0 : index
    %c0_220 = arith.constant 0 : index
    %440 = vector.load %arg5[%439, %c0_219, %c0_220] : memref<8x8x64xf32, #tpu.memory_space<vmem>>, vector<1x8x32xf32>
    %441 = vector.shape_cast %440 : vector<1x8x32xf32> to vector<8x32xf32>
    %442 = vector.shape_cast %418 : vector<8x32xf32> to vector<1x8x32xf32>
    tpu.vector_store %arg5[%439, %c0_219, %c0_220], %442 {strides = array<i32>} : memref<8x8x64xf32, #tpu.memory_space<vmem>>, vector<1x8x32xf32>,
    %443 = arith.index_cast %386 : i32 to index
    %c0_221 = arith.constant 0 : index
    %c32_222 = arith.constant 32 : index
    %444 = vector.load %arg5[%443, %c0_221, %c32_222] : memref<8x8x64xf32, #tpu.memory_space<vmem>>, vector<1x8x32xf32>
    %445 = vector.shape_cast %444 : vector<1x8x32xf32> to vector<8x32xf32>
    %446 = vector.shape_cast %434 : vector<8x32xf32> to vector<1x8x32xf32>
    tpu.vector_store %arg5[%443, %c0_221, %c32_222], %446 {strides = array<i32>} : memref<8x8x64xf32, #tpu.memory_space<vmem>>, vector<1x8x32xf32>,
    %c7_i32_223 = arith.constant 7 : i32
    %c7_i32_224 = arith.constant 7 : i32
    %447 = arith.subi %c7_i32_224, %c7_i32_223 : i32
    %c8_i32_225 = arith.constant 8 : i32
    %448 = arith.muli %c7_i32_223, %c8_i32_225 : i32
    %449 = tpu.assume_multiple %448, 8 : i32
    %c8_i32_226 = arith.constant 8 : i32
    %450 = arith.muli %447, %c8_i32_226 : i32
    %451 = tpu.assume_multiple %450, 8 : i32
    %452 = arith.index_cast %449 : i32 to index
    %c0_227 = arith.constant 0 : index
    %453 = vector.load %arg6[%452, %c0_227] : memref<64x256xf32, #tpu.memory_space<vmem>>, vector<8x128xf32>
    %454 = arith.index_cast %451 : i32 to index
    %c128_228 = arith.constant 128 : index
    %455 = vector.load %arg6[%454, %c128_228] : memref<64x256xf32, #tpu.memory_space<vmem>>, vector<8x128xf32>
    %c0_229 = arith.constant 0 : index
    %c0_230 = arith.constant 0 : index
    %456 = vector.load %arg7[%c0_229, %c0_230] : memref<8x32xf32, #tpu.memory_space<vmem>>, vector<8x32xf32>
    %457 = arith.truncf %456 : vector<8x32xf32> to vector<8x32xbf16>
    %cst_231 = arith.constant dense<0.000000e+00> : vector<8x128xf32>
    %458 = tpu.matmul %457, %17, %cst_231 {dimension_numbers = #tpu.dot_dimension_numbers<[1], [0], [0], [1], [0, 0, 1, 1], [], []>} : vector<8x32xbf16>, vector<32x128xbf16>, vector<8x128xf32> -> vector<8x128xf32>
    %459 = arith.addf %453, %458 : vector<8x128xf32>
    %c0_232 = arith.constant 0 : index
    %c0_233 = arith.constant 0 : index
    %460 = vector.load %arg9[%c0_232, %c0_233] : memref<8x32xf32, #tpu.memory_space<vmem>>, vector<8x32xf32>
    %461 = arith.truncf %460 : vector<8x32xf32> to vector<8x32xbf16>
    %cst_234 = arith.constant dense<0.000000e+00> : vector<8x128xf32>
    %462 = tpu.matmul %461, %19, %cst_234 {dimension_numbers = #tpu.dot_dimension_numbers<[1], [0], [0], [1], [0, 0, 1, 1], [], []>} : vector<8x32xbf16>, vector<32x128xbf16>, vector<8x128xf32> -> vector<8x128xf32>
    %463 = arith.addf %455, %462 : vector<8x128xf32>
    %c0_235 = arith.constant 0 : index
    %c0_236 = arith.constant 0 : index
    %464 = vector.load %arg8[%c0_235, %c0_236] : memref<8x32xf32, #tpu.memory_space<vmem>>, vector<8x32xf32>
    %465 = arith.negf %459 : vector<8x128xf32>
    %466 = math.exp %465 : vector<8x128xf32>
    %cst_237 = arith.constant 1.000000e+00 : f32
    %467 = vector.broadcast %cst_237 : f32 to vector<8x128xf32>
    %468 = arith.addf %467, %466 : vector<8x128xf32>
    %469 = arith.divf %467, %468 : vector<8x128xf32>
    %470 = math.tanh %459 : vector<8x128xf32>
    %471 = vector.extract_strided_slice %469 {offsets = [0, 0], sizes = [8, 32], strides = [1, 1]} : vector<8x128xf32> to vector<8x32xf32>
    %472 = vector.extract_strided_slice %469 {offsets = [0, 32], sizes = [8, 32], strides = [1, 1]} : vector<8x128xf32> to vector<8x32xf32>
    %473 = vector.extract_strided_slice %470 {offsets = [0, 64], sizes = [8, 32], strides = [1, 1]} : vector<8x128xf32> to vector<8x32xf32>
    %474 = vector.extract_strided_slice %469 {offsets = [0, 96], sizes = [8, 32], strides = [1, 1]} : vector<8x128xf32> to vector<8x32xf32>
    %475 = arith.mulf %472, %464 : vector<8x32xf32>
    %476 = arith.mulf %471, %473 : vector<8x32xf32>
    %477 = arith.addf %475, %476 : vector<8x32xf32>
    %478 = math.tanh %477 : vector<8x32xf32>
    %479 = arith.mulf %474, %478 : vector<8x32xf32>
    %c0_238 = arith.constant 0 : index
    %c0_239 = arith.constant 0 : index
    %480 = vector.load %arg10[%c0_238, %c0_239] : memref<8x32xf32, #tpu.memory_space<vmem>>, vector<8x32xf32>
    %481 = arith.negf %463 : vector<8x128xf32>
    %482 = math.exp %481 : vector<8x128xf32>
    %cst_240 = arith.constant 1.000000e+00 : f32
    %483 = vector.broadcast %cst_240 : f32 to vector<8x128xf32>
    %484 = arith.addf %483, %482 : vector<8x128xf32>
    %485 = arith.divf %483, %484 : vector<8x128xf32>
    %486 = math.tanh %463 : vector<8x128xf32>
    %487 = vector.extract_strided_slice %485 {offsets = [0, 0], sizes = [8, 32], strides = [1, 1]} : vector<8x128xf32> to vector<8x32xf32>
    %488 = vector.extract_strided_slice %485 {offsets = [0, 32], sizes = [8, 32], strides = [1, 1]} : vector<8x128xf32> to vector<8x32xf32>
    %489 = vector.extract_strided_slice %486 {offsets = [0, 64], sizes = [8, 32], strides = [1, 1]} : vector<8x128xf32> to vector<8x32xf32>
    %490 = vector.extract_strided_slice %485 {offsets = [0, 96], sizes = [8, 32], strides = [1, 1]} : vector<8x128xf32> to vector<8x32xf32>
    %491 = arith.mulf %488, %480 : vector<8x32xf32>
    %492 = arith.mulf %487, %489 : vector<8x32xf32>
    %493 = arith.addf %491, %492 : vector<8x32xf32>
    %494 = math.tanh %493 : vector<8x32xf32>
    %495 = arith.mulf %490, %494 : vector<8x32xf32>
    %c0_241 = arith.constant 0 : index
    %c0_242 = arith.constant 0 : index
    %496 = vector.load %arg7[%c0_241, %c0_242] : memref<8x32xf32, #tpu.memory_space<vmem>>, vector<8x32xf32>
    tpu.vector_store %arg7[%c0_241, %c0_242], %479 {strides = array<i32>} : memref<8x32xf32, #tpu.memory_space<vmem>>, vector<8x32xf32>,
    %c0_243 = arith.constant 0 : index
    %c0_244 = arith.constant 0 : index
    %497 = vector.load %arg8[%c0_243, %c0_244] : memref<8x32xf32, #tpu.memory_space<vmem>>, vector<8x32xf32>
    tpu.vector_store %arg8[%c0_243, %c0_244], %477 {strides = array<i32>} : memref<8x32xf32, #tpu.memory_space<vmem>>, vector<8x32xf32>,
    %c0_245 = arith.constant 0 : index
    %c0_246 = arith.constant 0 : index
    %498 = vector.load %arg9[%c0_245, %c0_246] : memref<8x32xf32, #tpu.memory_space<vmem>>, vector<8x32xf32>
    tpu.vector_store %arg9[%c0_245, %c0_246], %495 {strides = array<i32>} : memref<8x32xf32, #tpu.memory_space<vmem>>, vector<8x32xf32>,
    %c0_247 = arith.constant 0 : index
    %c0_248 = arith.constant 0 : index
    %499 = vector.load %arg10[%c0_247, %c0_248] : memref<8x32xf32, #tpu.memory_space<vmem>>, vector<8x32xf32>
    tpu.vector_store %arg10[%c0_247, %c0_248], %493 {strides = array<i32>} : memref<8x32xf32, #tpu.memory_space<vmem>>, vector<8x32xf32>,
    %500 = arith.index_cast %c7_i32_223 : i32 to index
    %c0_249 = arith.constant 0 : index
    %c0_250 = arith.constant 0 : index
    %501 = vector.load %arg5[%500, %c0_249, %c0_250] : memref<8x8x64xf32, #tpu.memory_space<vmem>>, vector<1x8x32xf32>
    %502 = vector.shape_cast %501 : vector<1x8x32xf32> to vector<8x32xf32>
    %503 = vector.shape_cast %479 : vector<8x32xf32> to vector<1x8x32xf32>
    tpu.vector_store %arg5[%500, %c0_249, %c0_250], %503 {strides = array<i32>} : memref<8x8x64xf32, #tpu.memory_space<vmem>>, vector<1x8x32xf32>,
    %504 = arith.index_cast %447 : i32 to index
    %c0_251 = arith.constant 0 : index
    %c32_252 = arith.constant 32 : index
    %505 = vector.load %arg5[%504, %c0_251, %c32_252] : memref<8x8x64xf32, #tpu.memory_space<vmem>>, vector<1x8x32xf32>
    %506 = vector.shape_cast %505 : vector<1x8x32xf32> to vector<8x32xf32>
    %507 = vector.shape_cast %495 : vector<8x32xf32> to vector<1x8x32xf32>
    tpu.vector_store %arg5[%504, %c0_251, %c32_252], %507 {strides = array<i32>} : memref<8x8x64xf32, #tpu.memory_space<vmem>>, vector<1x8x32xf32>,
    %c8_i32_253 = arith.constant 8 : i32
    return
  }
  func.func @transform_0(%arg0: i32) -> (i32, i32) {
    %c0_i32 = arith.constant 0 : i32
    %c0_i32_0 = arith.constant 0 : i32
    %c0_i32_1 = arith.constant 0 : i32
    return %c0_i32, %c0_i32_0 : i32, i32
  }
  func.func @transform_1(%arg0: i32) -> (i32, i32) {
    %c0_i32 = arith.constant 0 : i32
    %c0_i32_0 = arith.constant 0 : i32
    %c0_i32_1 = arith.constant 0 : i32
    return %c0_i32, %c0_i32_0 : i32, i32
  }
  func.func @transform_2(%arg0: i32) -> (i32, i32) {
    %c0_i32 = arith.constant 0 : i32
    %c0_i32_0 = arith.constant 0 : i32
    %c0_i32_1 = arith.constant 0 : i32
    return %c0_i32, %c0_i32_0 : i32, i32
  }
  func.func @transform_3(%arg0: i32) -> (i32, i32, i32) {
    %c0_i32 = arith.constant 0 : i32
    %c0_i32_0 = arith.constant 0 : i32
    %c0_i32_1 = arith.constant 0 : i32
    %c0_i32_2 = arith.constant 0 : i32
    return %c0_i32, %c0_i32_0, %c0_i32_1 : i32, i32, i32
  }
  func.func @transform_4(%arg0: i32) -> (i32, i32, i32) {
    %c0_i32 = arith.constant 0 : i32
    %c0_i32_0 = arith.constant 0 : i32
    %c0_i32_1 = arith.constant 0 : i32
    %c0_i32_2 = arith.constant 0 : i32
    return %c0_i32, %c0_i32_0, %c0_i32_1 : i32, i32, i32
  }
}

</mosaic_0001>

<bundles_post_ra>
// kernel: tpu_custom_call.1
= control target key start
LH: loop header
LB: loop body
LE: loop exit
PB: predicated region body
PF: predicated region fallthrough
CT: control target
= control target key end

     0   :  { %v2060_v1 = vmov 0.0   ;;  %v2061_v3 = vmov 0   ;;  %vm157_vm0 = vcmask 261120   ;;  %vm55_vm1 = vcmask 130048   ;;  %s2528_s0 = inlined_call_operand.vmem [shape: f32[64,16], index: 0, kind: input, shape index: {}]   ;;  %s2529_s1 = inlined_call_operand.vmem [shape: bf16[16,256], index: 1, kind: input, shape index: {}]   ;;  %s2530_s2 = inlined_call_operand.vmem [shape: f32[1,256], index: 2, kind: input, shape index: {}]   ;;  %s2531_s3 = inlined_call_operand.vmem [shape: bf16[2,32,128], index: 3, kind: input, shape index: {}]   ;;  %s2532_s4 = inlined_call_operand.hbm [shape: f32[8,8,64], index: 4, kind: output, shape index: {}]  }
   0x1   :  { %v1897_v0 = vld [vmem:[%s2529_s1 + $0x4] ss:$8 sps:$4 sm:$0xff]   ;;  %1760 = vmatprep.subr.bf16.mxu1 %v2060_v1  ;;  %v1899_v2 = vld [vmem:[%s2529_s1] ss:$8 sps:$4 sm:$0xff]   ;;  %100 = vmatprep.mubr.bf16.mxu0 %v2061_v3  ;;  %vm2062_vm2 = vmmov 0   ;;  %158 = vst.msk [vmem:[#allocation3] sm:$0xff] %vm157_vm0, %v2060_v1 }
   0x2   :  { %68 = vmatprep.subr.bf16.mxu0 %v1897_v0  ;;  %v2104_v4 = vld [vmem:[%s2531_s3] sm:$0xff]   ;;  %v20_v6 = vld [vmem:[%s2528_s0 + $0x8] sm:$0xff]  ;;  %1764 = vmatprep.mubr.msk.bf16.mxu1 %vm2062_vm2, %v2060_v1  ;;  %159 = vst.msk [vmem:[#allocation4] sm:$0xff] %vm157_vm0, %v2060_v1  ;;  %160 = vst.msk [vmem:[#allocation5] sm:$0xff] %vm157_vm0, %v2060_v1 }
   0x3   :  { %v19_v5 = vld [vmem:[%s2528_s0] sm:$0xff]  ;;  %69 = vmatpush1.bf16.msra.mxu0 %v1899_v2  ;;  %161 = vst.msk [vmem:[#allocation6] sm:$0xff] %vm157_vm0, %v2060_v1  ;;  %1761 = vmatpush3.bf16.msra.mxu1 %v2104_v4  ;;  %v2126_v8 = vld [vmem:[%s2531_s3 + $0x8] sm:$0xff]   ;;  %v21_v9 = vld [vmem:[%s2528_s0 + $0x10] sm:$0xff] }
   0x4   :  { %v27_v7 = vpack.c.bf16 %v20_v6, %v19_v5  ;;  %1792 = vmatprep.subr.bf16.mxu0 %v2060_v1  ;;  %1762 = vmatprep.subr.bf16.mxu1 %v2060_v1  ;;  %v22_v10 = vld [vmem:[%s2528_s0 + $0x18] sm:$0xff] }
   0x6   :  { %1668 = vmatmul.mubr.msk.bf16.vlgmr.msra.gmra.mrb[0].mxu0 %vm55_vm1, %v27_v7 }
   0x7   :  { %110 = vmatprep.mubr.bf16.mxu0 %v2061_v3  ;;  %1793 = vmatpush3.bf16.msra.mxu0 %v2104_v4 }
   0x8   :  { %1763 = vmatpush3.bf16.msra.mxu1 %v2126_v8  ;;  %1794 = vmatprep.subr.bf16.mxu0 %v2060_v1 }
   0x9   :  { %9 = vsyncpa [#allocation8], 0  ;;  %1768 = vmatprep.subr.bf16.mxu1 %v2060_v1  ;;  %v179_v11 = vld [vmem:[#allocation3] sm:$0xff]  ;;  %v28_v12 = vpack.c.bf16 %v22_v10, %v21_v9  ;;  %v2144_v13 = vld [vmem:[%s2531_s3 + $0x10] sm:$0xff]   ;;  %s2063_s6 = smov 32   ;;  %v35_v25 = vlaneseq  ;;  %s2065_s18 = smov 96  }
   0xa   :  { %v295_v14 = vld [vmem:[#allocation4] sm:$0xff]  ;;  %v180_v15 = vpack.c.bf16 %v179_v11, %v179_v11  ;;  %v2155_v16 = vld [vmem:[%s2531_s3 + $0x18] sm:$0xff]   ;;  %v237_v17 = vld [vmem:[#allocation5] sm:$0xff]  ;;  %vm378_vm3 = vcmask 523520  }
   0xb   :  { %304 = vrot.lane.b32.xlu1 %v295_v14, %s2063_s6  ;;  %1795 = vmatpush3.bf16.msra.mxu0 %v2126_v8  ;;  %v23_v18 = vld [vmem:[%s2528_s0 + $0x20] sm:$0xff]  ;;  %v24_v19 = vld [vmem:[%s2528_s0 + $0x28] sm:$0xff]  ;;  %v238_v20 = vpack.c.bf16 %v237_v17, %v237_v17  ;;  %v25_v22 = vld [vmem:[%s2528_s0 + $0x30] sm:$0xff]  ;;  %v36_v26 = vshrl.u32 %v35_v25, 7 }
   0xc   :  { %1808 = vmatprep.subr.bf16.mxu0 %v2060_v1  ;;  %1765 = vmatmul.mubr.msk.bf16.vlgmr.msra.gmra.mrb[0].mxu1 %vm157_vm0, %v180_v15  ;;  %v29_v21 = vpack.c.bf16 %v24_v19, %v23_v18  ;;  %v26_v23 = vld [vmem:[%s2528_s0 + $0x38] sm:$0xff]  ;;  %v33_v28 = vld [vmem:[%s2530_s2] sm:$0x3]  ;;  %s2064_s2 = smov 64  }
   0xd   :  { %1769 = vmatpush3.bf16.msra.mxu1 %v2144_v13  ;;  %1772 = vmatprep.mubr.msk.bf16.mxu1 %vm2062_vm2, %v2060_v1  ;;  %v30_v24 = vpack.c.bf16 %v26_v23, %v25_v22  ;;  %v41_v27 = vsub.s32 1, %v36_v26  ;;  %v37_v29 = vsub.s32 0, %v36_v26  ;;  %v324_v17 = vld [vmem:[#allocation6] sm:$0xff] }
   0xe   :  { %1669 = vmatmul.mubr.msk.bf16.gmra.mrb[4].mxu0 %vm55_vm1, %v28_v12  ;;  %1770 = vmatprep.subr.bf16.mxu1 %v2060_v1 }
   0xf   :  { %120 = vmatprep.mubr.bf16.mxu0 %v2061_v3  ;;  %v42_v30 = vrot.slane %v33_v28, %v41_v27  ;;  %v38_v32 = vrot.slane %v33_v28, %v37_v29 }
  0x11   :  { %1771 = vmatpush3.bf16.msra.mxu1 %v2155_v16 }
  0x12   :  { %1776 = vmatprep.subr.bf16.mxu1 %v2060_v1 }
  0x14   :  { %1773 = vmatmul.mubr.msk.bf16.vlgmr.msra.gmra.mrb[4].mxu1 %vm157_vm0, %v238_v20 }
  0x15   :  { %1777 = vmatpush3.bf16.msra.mxu1 %v2104_v4  ;;  %1780 = vmatprep.mubr.msk.bf16.mxu1 %vm2062_vm2, %v2060_v1 }
  0x16   :  { %1670 = vmatmul.mubr.msk.bf16.gmra.mrb[8].mxu0 %vm55_vm1, %v29_v21  ;;  %1778 = vmatprep.subr.bf16.mxu1 %v2060_v1 }
  0x17   :  { %130 = vmatprep.mubr.bf16.mxu0 %v2061_v3 }
  0x19   :  { %1779 = vmatpush3.bf16.msra.mxu1 %v2126_v8 }
  0x1a   :  { %1784 = vmatprep.subr.bf16.mxu1 %v2060_v1 }
  0x1e   :  { %1671 = vmatmul.mubr.msk.bf16.gmra.mrb[12].mxu0 %vm55_vm1, %v30_v24 }
  0x1f   :  { %1796 = vmatprep.mubr.msk.bf16.mxu0 %vm2062_vm2, %v2060_v1 }
  0xd9   :  { %v102_v31 = vpop.f32.mrb[0].mxu0 }
  0xda   :  { %v104_v33 = vpop.f32.mrb[1].mxu0  ;;  %v103_v39 = vadd.f32 %v102_v31, %v38_v32 }
  0xdb   :  { %v2188_v34 = vadd.f32 %v104_v33, %v42_v30  ;;  %v106_v35 = vpop.f32.mrb[2].mxu0 }
  0xdc   :  { %v2190_v36 = vadd.f32 %v106_v35, %v38_v32  ;;  %v108_v37 = vpop.f32.mrb[3].mxu0 }
  0xdd   :  { %v2192_v38 = vadd.f32 %v108_v37, %v42_v30 }
  0xdf   :  { %v230_v40 = vpop.f32.mrb[0].mxu1 }
  0xe0   :  { %v236_v41 = vadd.f32 %v230_v40, %v103_v39  ;;  %v1766_v43 = vpop.f32.mrb[1].mxu1 }
  0xe1   :  { %v112_v42 = vpop.f32.mrb[4].mxu0  ;;  %v233_v46 = vpop.f32.mrb[2].mxu1 }
  0xe2   :  { %v2194_v44 = vadd.f32 %v112_v42, %v38_v32  ;;  %v114_v45 = vpop.f32.mrb[5].mxu0  ;;  %1904 = vtanh.f32 %v236_v41  ;;  %v1767_v49 = vpop.f32.mrb[3].mxu1  ;;  %v1682_v18 = vmul.f32 -1.442695, %v236_v41 }
  0xe3   :  { %v2196_v47 = vadd.f32 %v114_v45, %v42_v30  ;;  %v116_v48 = vpop.f32.mrb[6].mxu0 }
  0xe4   :  { %v2198_v50 = vadd.f32 %v116_v48, %v38_v32  ;;  %v118_v51 = vpop.f32.mrb[7].mxu0 }
  0xe5   :  { %v2200_v52 = vadd.f32 %v118_v51, %v42_v30 }
  0xe7   :  { %v288_v53 = vpop.f32.mrb[4].mxu1 }
  0xe8   :  { %v1774_v55 = vpop.f32.mrb[5].mxu1 }
  0xe9   :  { %v122_v54 = vpop.f32.mrb[8].mxu0  ;;  %v291_v58 = vpop.f32.mrb[6].mxu1 }
  0xea   :  { %v2202_v56 = vadd.f32 %v122_v54, %v38_v32  ;;  %v124_v57 = vpop.f32.mrb[9].mxu0  ;;  %v1775_v61 = vpop.f32.mrb[7].mxu1 }
  0xeb   :  { %v2204_v59 = vadd.f32 %v124_v57, %v42_v30  ;;  %v126_v60 = vpop.f32.mrb[10].mxu0 }
  0xec   :  { %v2206_v62 = vadd.f32 %v126_v60, %v38_v32  ;;  %v128_v63 = vpop.f32.mrb[11].mxu0  ;;  %v1905_v0 = vpop.eup %1904 }
  0xed   :  { %v2208_v2 = vadd.f32 %v128_v63, %v42_v30  ;;  %309 = vrot.lane.b32.xlu0 %v1905_v0, %s2064_s2 }
  0xf1   :  { %v132_v3 = vpop.f32.mrb[12].mxu0 }
  0xf2   :  { %v2211_v5 = vadd.f32 %v132_v3, %v38_v32  ;;  %v134_v6 = vpop.f32.mrb[13].mxu0 }
  0xf3   :  { %v2213_v7 = vadd.f32 %v134_v6, %v42_v30  ;;  %v136_v9 = vpop.f32.mrb[14].mxu0 }
  0xf4   :  { %v2215_v10 = vadd.f32 %v136_v9, %v38_v32  ;;  %v138_v11 = vpop.f32.mrb[15].mxu0 }
  0xf5   :  { %v139_v12 = vadd.f32 %v138_v11, %v42_v30  ;;  %v305_v30 = vpop.permute.xlu1 %304 }
  0xf7   :  { %v294_v14 = vadd.f32 %v288_v53, %v139_v12 }
  0xf9   :  { %1906 = vtanh.f32 %v294_v14  ;;  %v1683_v21 = vmul.f32 -1.442695, %v294_v14 }
  0xfa   :  { %1908 = vpow2.f32 %v1682_v18 }
 0x103   :  { %v1907_v15 = vpop.eup %1906 }
 0x104   :  { %338 = vrot.lane.b32.xlu0 %v1907_v15, %s2064_s2  ;;  %v1909_v19 = vpop.eup %1908 }
 0x105   :  { %v299_v20 = vadd.f32 1.0, %v1909_v19 }
 0x107   :  { %1910 = vrcp.f32 %v299_v20 }
 0x108   :  { %333 = vrot.lane.b32.xlu0 %v324_v17, %s2063_s6  ;;  %1912 = vpow2.f32 %v1683_v21 }
 0x111   :  { %v1911_v22 = vpop.eup %1910 }
 0x112   :  { %v1913_v25 = vpop.eup %1912  ;;  %v307_v31 = vmul.f32 %v1911_v22, %v305_v30 }
 0x113   :  { %v328_v26 = vadd.f32 1.0, %v1913_v25 }
 0x115   :  { %1914 = vrcp.f32 %v328_v26 }
 0x11f   :  { %v1915_v27 = vpop.eup %1914 }
 0x15f   :  { %v310_v23 = vpop.permute.xlu0 %309 }
 0x160   :  { %v312_v24 = vmul.f32 %v1911_v22, %v310_v23 }
 0x162   :  { %314 = vrot.lane.b32.xlu1 %v312_v24, %s2063_s6 }
 0x176   :  { %v339_v28 = vpop.permute.xlu0 %338 }
 0x177   :  { %v341_v29 = vmul.f32 %v1915_v27, %v339_v28 }
 0x179   :  { %343 = vrot.lane.b32.xlu1 %v341_v29, %s2063_s6 }
 0x17a   :  { %v334_v37 = vpop.permute.xlu0 %333 }
 0x17b   :  { %v336_v39 = vmul.f32 %v1915_v27, %v334_v37 }
 0x1d4   :  { %v315_v32 = vpop.permute.xlu1 %314 }
 0x1d5   :  { %v317_v33 = vadd.f32 %v315_v32, %v307_v31 }
 0x1d7   :  { %1916 = vtanh.f32 %v317_v33 }
 0x1e1   :  { %v1917_v35 = vpop.eup %1916 }
 0x1e2   :  { %320 = vrot.lane.b32.xlu0 %v1917_v35, %s2064_s2 }
 0x1eb   :  { %v344_v40 = vpop.permute.xlu1 %343 }
 0x1ec   :  { %v346_v41 = vadd.f32 %v344_v40, %v336_v39 }
 0x1ee   :  { %1918 = vtanh.f32 %v346_v41 }
 0x1f8   :  { %v1919_v42 = vpop.eup %1918 }
 0x1f9   :  { %349 = vrot.lane.b32.xlu1 %v1919_v42, %s2064_s2 }
 0x254   :  { %v321_v43 = vpop.permute.xlu0 %320 }
 0x255   :  { %v323_v45 = vmul.f32 %v1911_v22, %v321_v43 }
 0x257   :  { %354 = vrot.lane.b32.xlu0 %v323_v45, %s2063_s6 }
 0x25b   :  { %359 = vrot.lane.b32.xlu0 %v317_v33, %s2065_s18 }
 0x26b   :  { %v350_v46 = vpop.permute.xlu1 %349 }
 0x26c   :  { %v2225_v48 = vmul.f32 %v1915_v27, %v350_v46 }
 0x26e   :  { %364 = vrot.lane.b32.xlu1 %v2225_v48, %s2063_s6 }
 0x272   :  { %369 = vrot.lane.b32.xlu1 %v346_v41, %s2065_s18 }
 0x2c9   :  { %v355_v49 = vpop.permute.xlu0 %354 }
 0x2ca   :  { %357 = vst.msk [vmem:[#allocation3] sm:$0xff] %vm157_vm0, %v355_v49  ;;  %373 = vst.msk [vmem:[#allocation7] sm:$0xff] %vm157_vm0, %v355_v49 }
 0x2cd   :  { %v360_v51 = vpop.permute.xlu0 %359 }
 0x2ce   :  { %362 = vst.msk [vmem:[#allocation4] sm:$0xff] %vm157_vm0, %v360_v51 }
 0x2d1   :  { %v388_v53 = vld [vmem:[#allocation3] sm:$0xff] }
 0x2d2   :  { %v389_v54 = vpack.c.bf16 %v388_v53, %v388_v53 }
 0x2d4   :  { %1781 = vmatmul.mubr.msk.bf16.vlgmr.msra.gmra.mrb[8].mxu1 %vm157_vm0, %v389_v54 }
 0x2d5   :  { %1785 = vmatpush3.bf16.msra.mxu1 %v2144_v13  ;;  %1788 = vmatprep.mubr.msk.bf16.mxu1 %vm2062_vm2, %v2060_v1  ;;  %v480_v11 = vld [vmem:[#allocation4] sm:$0xff] }
 0x2d6   :  { %1786 = vmatprep.subr.bf16.mxu1 %v2060_v1 }
 0x2d9   :  { %1787 = vmatpush3.bf16.msra.mxu1 %v2155_v16 }
 0x2da   :  { %1800 = vmatprep.subr.bf16.mxu1 %v2060_v1 }
 0x2e0   :  { %v365_v55 = vpop.permute.xlu1 %364 }
 0x2e1   :  { %367 = vst.msk [vmem:[#allocation5] sm:$0xff] %vm157_vm0, %v365_v55 }
 0x2e4   :  { %v370_v57 = vpop.permute.xlu1 %369 }
 0x2e5   :  { %372 = vst.msk [vmem:[#allocation6] sm:$0xff] %vm157_vm0, %v370_v57 }
 0x2e8   :  { %v434_v58 = vld [vmem:[#allocation5] sm:$0xff] }
 0x2e9   :  { %v435_v60 = vpack.c.bf16 %v434_v58, %v434_v58 }
 0x2eb   :  { %1789 = vmatmul.mubr.msk.bf16.vlgmr.msra.gmra.mrb[12].mxu1 %vm157_vm0, %v435_v60 }
 0x2ec   :  { %1801 = vmatpush3.bf16.msra.mxu1 %v2144_v13  ;;  %1804 = vmatprep.mubr.msk.bf16.mxu1 %vm2062_vm2, %v2060_v1 }
 0x2ed   :  { %1802 = vmatprep.subr.bf16.mxu1 %v2060_v1 }
 0x2f0   :  { %1803 = vmatpush3.bf16.msra.mxu1 %v2155_v16 }
 0x2f1   :  { %1816 = vmatprep.subr.bf16.mxu1 %v2060_v1 }
 0x3a7   :  { %v427_v61 = vpop.f32.mrb[8].mxu1 }
 0x3a8   :  { %v433_v63 = vadd.f32 %v427_v61, %v2190_v36  ;;  %v1782_v0 = vpop.f32.mrb[9].mxu1  ;;  %v509_v36 = vld [vmem:[#allocation6] sm:$0xff] }
 0x3a9   :  { %v430_v3 = vpop.f32.mrb[10].mxu1 }
 0x3aa   :  { %1920 = vtanh.f32 %v433_v63  ;;  %v1783_v6 = vpop.f32.mrb[11].mxu1  ;;  %v1686_v20 = vmul.f32 -1.442695, %v433_v63 }
 0x3b4   :  { %v1921_v9 = vpop.eup %1920 }
 0x3b5   :  { %494 = vrot.lane.b32.xlu0 %v1921_v9, %s2064_s2 }
 0x3b9   :  { %489 = vrot.lane.b32.xlu0 %v480_v11, %s2063_s6 }
 0x3be   :  { %v473_v12 = vpop.f32.mrb[12].mxu1 }
 0x3bf   :  { %v479_v14 = vadd.f32 %v473_v12, %v2213_v7  ;;  %v1790_v15 = vpop.f32.mrb[13].mxu1 }
 0x3c0   :  { %v476_v17 = vpop.f32.mrb[14].mxu1 }
 0x3c1   :  { %1922 = vtanh.f32 %v479_v14  ;;  %v1791_v18 = vpop.f32.mrb[15].mxu1  ;;  %v1687_v23 = vmul.f32 -1.442695, %v479_v14 }
 0x3c2   :  { %1924 = vpow2.f32 %v1686_v20 }
 0x3cb   :  { %v1923_v19 = vpop.eup %1922 }
 0x3cc   :  { %523 = vrot.lane.b32.xlu1 %v1923_v19, %s2064_s2  ;;  %v1925_v21 = vpop.eup %1924 }
 0x3cd   :  { %v484_v22 = vadd.f32 1.0, %v1925_v21 }
 0x3cf   :  { %1926 = vrcp.f32 %v484_v22 }
 0x3d0   :  { %518 = vrot.lane.b32.xlu1 %v509_v36, %s2063_s6  ;;  %1928 = vpow2.f32 %v1687_v23 }
 0x3d9   :  { %v1927_v24 = vpop.eup %1926 }
 0x3da   :  { %v1929_v26 = vpop.eup %1928 }
 0x3db   :  { %v513_v27 = vadd.f32 1.0, %v1929_v26 }
 0x3dd   :  { %1930 = vrcp.f32 %v513_v27 }
 0x3e7   :  { %v1931_v28 = vpop.eup %1930 }
 0x427   :  { %v495_v25 = vpop.permute.xlu0 %494 }
 0x428   :  { %v497_v7 = vmul.f32 %v1927_v24, %v495_v25 }
 0x42a   :  { %499 = vrot.lane.b32.xlu0 %v497_v7, %s2063_s6 }
 0x42b   :  { %v490_v31 = vpop.permute.xlu0 %489 }
 0x42c   :  { %v492_v32 = vmul.f32 %v1927_v24, %v490_v31 }
 0x43e   :  { %v524_v29 = vpop.permute.xlu1 %523 }
 0x43f   :  { %v526_v30 = vmul.f32 %v1931_v28, %v524_v29 }
 0x441   :  { %528 = vrot.lane.b32.xlu1 %v526_v30, %s2063_s6 }
 0x442   :  { %v519_v39 = vpop.permute.xlu1 %518 }
 0x443   :  { %v521_v40 = vmul.f32 %v1931_v28, %v519_v39 }
 0x49c   :  { %v500_v33 = vpop.permute.xlu0 %499 }
 0x49d   :  { %v502_v35 = vadd.f32 %v500_v33, %v492_v32 }
 0x49f   :  { %1932 = vtanh.f32 %v502_v35 }
 0x4a9   :  { %v1933_v37 = vpop.eup %1932 }
 0x4aa   :  { %505 = vrot.lane.b32.xlu0 %v1933_v37, %s2064_s2 }
 0x4b3   :  { %v529_v41 = vpop.permute.xlu1 %528 }
 0x4b4   :  { %v531_v42 = vadd.f32 %v529_v41, %v521_v40 }
 0x4b6   :  { %1934 = vtanh.f32 %v531_v42 }
 0x4c0   :  { %v1935_v43 = vpop.eup %1934 }
 0x4c1   :  { %534 = vrot.lane.b32.xlu1 %v1935_v43, %s2064_s2 }
 0x51c   :  { %v506_v45 = vpop.permute.xlu0 %505 }
 0x51d   :  { %v508_v46 = vmul.f32 %v1927_v24, %v506_v45 }
 0x51f   :  { %539 = vrot.lane.b32.xlu0 %v508_v46, %s2063_s6 }
 0x523   :  { %544 = vrot.lane.b32.xlu0 %v502_v35, %s2065_s18 }
 0x533   :  { %v535_v49 = vpop.permute.xlu1 %534 }
 0x534   :  { %v2261_v51 = vmul.f32 %v1931_v28, %v535_v49 }
 0x536   :  { %549 = vrot.lane.b32.xlu1 %v2261_v51, %s2063_s6 }
 0x53a   :  { %554 = vrot.lane.b32.xlu1 %v531_v42, %s2065_s18 }
 0x591   :  { %v540_v53 = vpop.permute.xlu0 %539 }
 0x592   :  { %542 = vst.msk [vmem:[#allocation3] sm:$0xff] %vm157_vm0, %v540_v53  ;;  %559 = vst.msk [vmem:[#allocation7 + $0x8] sm:$0xff] %vm157_vm0, %v540_v53 }
 0x595   :  { %v545_v54 = vpop.permute.xlu0 %544 }
 0x596   :  { %547 = vst.msk [vmem:[#allocation4] sm:$0xff] %vm157_vm0, %v545_v54 }
 0x599   :  { %v573_v55 = vld [vmem:[#allocation3] sm:$0xff] }
 0x59a   :  { %v574_v57 = vpack.c.bf16 %v573_v55, %v573_v55 }
 0x59c   :  { %1797 = vmatmul.mubr.msk.bf16.vlgmr.msra.gmra.mrb[16].mxu0 %vm157_vm0, %v574_v57 }
 0x59d   :  { %1809 = vmatpush3.bf16.msra.mxu0 %v2104_v4  ;;  %1812 = vmatprep.mubr.msk.bf16.mxu0 %vm2062_vm2, %v2060_v1  ;;  %v665_v14 = vld [vmem:[#allocation4] sm:$0xff] }
 0x59e   :  { %1810 = vmatprep.subr.bf16.mxu0 %v2060_v1 }
 0x5a1   :  { %1811 = vmatpush3.bf16.msra.mxu0 %v2126_v8 }
 0x5a2   :  { %1824 = vmatprep.subr.bf16.mxu0 %v2060_v1 }
 0x5a8   :  { %v550_v58 = vpop.permute.xlu1 %549 }
 0x5a9   :  { %552 = vst.msk [vmem:[#allocation5] sm:$0xff] %vm157_vm0, %v550_v58 }
 0x5ac   :  { %v555_v60 = vpop.permute.xlu1 %554 }
 0x5ad   :  { %557 = vst.msk [vmem:[#allocation6] sm:$0xff] %vm157_vm0, %v555_v60 }
 0x5b0   :  { %v619_v61 = vld [vmem:[#allocation5] sm:$0xff] }
 0x5b1   :  { %v620_v63 = vpack.c.bf16 %v619_v61, %v619_v61 }
 0x5b3   :  { %1805 = vmatmul.mubr.msk.bf16.vlgmr.msra.gmra.mrb[16].mxu1 %vm157_vm0, %v620_v63 }
 0x5b4   :  { %1817 = vmatpush3.bf16.msra.mxu1 %v2144_v13  ;;  %1820 = vmatprep.mubr.msk.bf16.mxu1 %vm2062_vm2, %v2060_v1 }
 0x5b5   :  { %1818 = vmatprep.subr.bf16.mxu1 %v2060_v1 }
 0x5b8   :  { %1819 = vmatpush3.bf16.msra.mxu1 %v2155_v16 }
 0x5b9   :  { %1832 = vmatprep.subr.bf16.mxu1 %v2060_v1 }
 0x66f   :  { %v612_v0 = vpop.f32.mrb[16].mxu0 }
 0x670   :  { %v618_v3 = vadd.f32 %v612_v0, %v2194_v44  ;;  %v1798_v6 = vpop.f32.mrb[17].mxu0  ;;  %v694_v44 = vld [vmem:[#allocation6] sm:$0xff] }
 0x671   :  { %v615_v9 = vpop.f32.mrb[18].mxu0 }
 0x672   :  { %1936 = vtanh.f32 %v618_v3  ;;  %v1799_v11 = vpop.f32.mrb[19].mxu0  ;;  %v1690_v21 = vmul.f32 -1.442695, %v618_v3 }
 0x67c   :  { %v1937_v12 = vpop.eup %1936 }
 0x67d   :  { %679 = vrot.lane.b32.xlu0 %v1937_v12, %s2064_s2 }
 0x681   :  { %674 = vrot.lane.b32.xlu0 %v665_v14, %s2063_s6 }
 0x686   :  { %v658_v15 = vpop.f32.mrb[16].mxu1 }
 0x687   :  { %v664_v17 = vadd.f32 %v658_v15, %v2208_v2  ;;  %v1806_v18 = vpop.f32.mrb[17].mxu1 }
 0x688   :  { %v661_v19 = vpop.f32.mrb[18].mxu1 }
 0x689   :  { %1938 = vtanh.f32 %v664_v17  ;;  %v1807_v36 = vpop.f32.mrb[19].mxu1  ;;  %v1691_v24 = vmul.f32 -1.442695, %v664_v17 }
 0x68a   :  { %1940 = vpow2.f32 %v1690_v21 }
 0x693   :  { %v1939_v20 = vpop.eup %1938 }
 0x694   :  { %708 = vrot.lane.b32.xlu1 %v1939_v20, %s2064_s2  ;;  %v1941_v22 = vpop.eup %1940 }
 0x695   :  { %v669_v23 = vadd.f32 1.0, %v1941_v22 }
 0x697   :  { %1942 = vrcp.f32 %v669_v23 }
 0x698   :  { %703 = vrot.lane.b32.xlu1 %v694_v44, %s2063_s6  ;;  %1944 = vpow2.f32 %v1691_v24 }
 0x6a1   :  { %v1943_v25 = vpop.eup %1942 }
 0x6a2   :  { %v1945_v26 = vpop.eup %1944 }
 0x6a3   :  { %v698_v27 = vadd.f32 1.0, %v1945_v26 }
 0x6a5   :  { %1946 = vrcp.f32 %v698_v27 }
 0x6af   :  { %v1947_v28 = vpop.eup %1946 }
 0x6ef   :  { %v680_v7 = vpop.permute.xlu0 %679 }
 0x6f0   :  { %v682_v2 = vmul.f32 %v1943_v25, %v680_v7 }
 0x6f2   :  { %684 = vrot.lane.b32.xlu0 %v682_v2, %s2063_s6 }
 0x6f3   :  { %v675_v31 = vpop.permute.xlu0 %674 }
 0x6f4   :  { %v677_v32 = vmul.f32 %v1943_v25, %v675_v31 }
 0x706   :  { %v709_v29 = vpop.permute.xlu1 %708 }
 0x707   :  { %v711_v30 = vmul.f32 %v1947_v28, %v709_v29 }
 0x709   :  { %713 = vrot.lane.b32.xlu1 %v711_v30, %s2063_s6 }
 0x70a   :  { %v704_v39 = vpop.permute.xlu1 %703 }
 0x70b   :  { %v706_v40 = vmul.f32 %v1947_v28, %v704_v39 }
 0x764   :  { %v685_v33 = vpop.permute.xlu0 %684 }
 0x765   :  { %v687_v35 = vadd.f32 %v685_v33, %v677_v32 }
 0x767   :  { %1948 = vtanh.f32 %v687_v35 }
 0x771   :  { %v1949_v37 = vpop.eup %1948 }
 0x772   :  { %690 = vrot.lane.b32.xlu0 %v1949_v37, %s2064_s2 }
 0x77b   :  { %v714_v41 = vpop.permute.xlu1 %713 }
 0x77c   :  { %v716_v42 = vadd.f32 %v714_v41, %v706_v40 }
 0x77e   :  { %1950 = vtanh.f32 %v716_v42 }
 0x788   :  { %v1951_v43 = vpop.eup %1950 }
 0x789   :  { %719 = vrot.lane.b32.xlu1 %v1951_v43, %s2064_s2 }
 0x7e4   :  { %v691_v45 = vpop.permute.xlu0 %690 }
 0x7e5   :  { %v693_v46 = vmul.f32 %v1943_v25, %v691_v45 }
 0x7e7   :  { %724 = vrot.lane.b32.xlu0 %v693_v46, %s2063_s6 }
 0x7eb   :  { %729 = vrot.lane.b32.xlu0 %v687_v35, %s2065_s18 }
 0x7fb   :  { %v720_v49 = vpop.permute.xlu1 %719 }
 0x7fc   :  { %v2297_v53 = vmul.f32 %v1947_v28, %v720_v49 }
 0x7fe   :  { %734 = vrot.lane.b32.xlu1 %v2297_v53, %s2063_s6 }
 0x802   :  { %739 = vrot.lane.b32.xlu1 %v716_v42, %s2065_s18 }
 0x859   :  { %v725_v54 = vpop.permute.xlu0 %724 }
 0x85a   :  { %727 = vst.msk [vmem:[#allocation3] sm:$0xff] %vm157_vm0, %v725_v54  ;;  %744 = vst.msk [vmem:[#allocation7 + $0x10] sm:$0xff] %vm157_vm0, %v725_v54 }
 0x85d   :  { %v730_v55 = vpop.permute.xlu0 %729 }
 0x85e   :  { %732 = vst.msk [vmem:[#allocation4] sm:$0xff] %vm157_vm0, %v730_v55 }
 0x861   :  { %v758_v57 = vld [vmem:[#allocation3] sm:$0xff] }
 0x862   :  { %v759_v58 = vpack.c.bf16 %v758_v57, %v758_v57 }
 0x864   :  { %1813 = vmatmul.mubr.msk.bf16.vlgmr.msra.gmra.mrb[20].mxu0 %vm157_vm0, %v759_v58 }
 0x865   :  { %1825 = vmatpush3.bf16.msra.mxu0 %v2104_v4  ;;  %1828 = vmatprep.mubr.msk.bf16.mxu0 %vm2062_vm2, %v2060_v1  ;;  %v850_v15 = vld [vmem:[#allocation4] sm:$0xff] }
 0x866   :  { %1826 = vmatprep.subr.bf16.mxu0 %v2060_v1 }
 0x869   :  { %1827 = vmatpush3.bf16.msra.mxu0 %v2126_v8 }
 0x86a   :  { %1840 = vmatprep.subr.bf16.mxu0 %v2060_v1 }
 0x870   :  { %v735_v60 = vpop.permute.xlu1 %734 }
 0x871   :  { %737 = vst.msk [vmem:[#allocation5] sm:$0xff] %vm157_vm0, %v735_v60 }
 0x874   :  { %v740_v61 = vpop.permute.xlu1 %739 }
 0x875   :  { %742 = vst.msk [vmem:[#allocation6] sm:$0xff] %vm157_vm0, %v740_v61 }
 0x878   :  { %v804_v63 = vld [vmem:[#allocation5] sm:$0xff] }
 0x879   :  { %v805_v0 = vpack.c.bf16 %v804_v63, %v804_v63 }
 0x87b   :  { %1821 = vmatmul.mubr.msk.bf16.vlgmr.msra.gmra.mrb[20].mxu1 %vm157_vm0, %v805_v0 }
 0x87c   :  { %1833 = vmatpush3.bf16.msra.mxu1 %v2144_v13  ;;  %1836 = vmatprep.mubr.msk.bf16.mxu1 %vm2062_vm2, %v2060_v1 }
 0x87d   :  { %1834 = vmatprep.subr.bf16.mxu1 %v2060_v1 }
 0x880   :  { %1835 = vmatpush3.bf16.msra.mxu1 %v2155_v16 }
 0x881   :  { %1848 = vmatprep.subr.bf16.mxu1 %v2060_v1 }
 0x937   :  { %v797_v3 = vpop.f32.mrb[20].mxu0 }
 0x938   :  { %v803_v6 = vadd.f32 %v797_v3, %v2198_v50  ;;  %v1814_v9 = vpop.f32.mrb[21].mxu0  ;;  %v879_v50 = vld [vmem:[#allocation6] sm:$0xff] }
 0x939   :  { %v800_v11 = vpop.f32.mrb[22].mxu0 }
 0x93a   :  { %1952 = vtanh.f32 %v803_v6  ;;  %v1815_v12 = vpop.f32.mrb[23].mxu0  ;;  %v1694_v21 = vmul.f32 -1.442695, %v803_v6 }
 0x944   :  { %v1953_v14 = vpop.eup %1952 }
 0x945   :  { %864 = vrot.lane.b32.xlu0 %v1953_v14, %s2064_s2 }
 0x949   :  { %859 = vrot.lane.b32.xlu0 %v850_v15, %s2063_s6 }
 0x94e   :  { %v843_v17 = vpop.f32.mrb[20].mxu1 }
 0x94f   :  { %v849_v18 = vadd.f32 %v843_v17, %v2204_v59  ;;  %v1822_v19 = vpop.f32.mrb[21].mxu1 }
 0x950   :  { %v846_v36 = vpop.f32.mrb[22].mxu1 }
 0x951   :  { %1954 = vtanh.f32 %v849_v18  ;;  %v1823_v20 = vpop.f32.mrb[23].mxu1  ;;  %v1695_v24 = vmul.f32 -1.442695, %v849_v18 }
 0x952   :  { %1956 = vpow2.f32 %v1694_v21 }
 0x95b   :  { %v1955_v44 = vpop.eup %1954 }
 0x95c   :  { %893 = vrot.lane.b32.xlu1 %v1955_v44, %s2064_s2  ;;  %v1957_v22 = vpop.eup %1956 }
 0x95d   :  { %v854_v23 = vadd.f32 1.0, %v1957_v22 }
 0x95f   :  { %1958 = vrcp.f32 %v854_v23 }
 0x960   :  { %888 = vrot.lane.b32.xlu1 %v879_v50, %s2063_s6  ;;  %1960 = vpow2.f32 %v1695_v24 }
 0x969   :  { %v1959_v25 = vpop.eup %1958 }
 0x96a   :  { %v1961_v2 = vpop.eup %1960 }
 0x96b   :  { %v883_v26 = vadd.f32 1.0, %v1961_v2 }
 0x96d   :  { %1962 = vrcp.f32 %v883_v26 }
 0x977   :  { %v1963_v27 = vpop.eup %1962 }
 0x9b7   :  { %v865_v7 = vpop.permute.xlu0 %864 }
 0x9b8   :  { %v867_v59 = vmul.f32 %v1959_v25, %v865_v7 }
 0x9ba   :  { %869 = vrot.lane.b32.xlu0 %v867_v59, %s2063_s6 }
 0x9bb   :  { %v860_v30 = vpop.permute.xlu0 %859 }
 0x9bc   :  { %v862_v31 = vmul.f32 %v1959_v25, %v860_v30 }
 0x9ce   :  { %v894_v28 = vpop.permute.xlu1 %893 }
 0x9cf   :  { %v896_v29 = vmul.f32 %v1963_v27, %v894_v28 }
 0x9d1   :  { %898 = vrot.lane.b32.xlu1 %v896_v29, %s2063_s6 }
 0x9d2   :  { %v889_v37 = vpop.permute.xlu1 %888 }
 0x9d3   :  { %v891_v39 = vmul.f32 %v1963_v27, %v889_v37 }
 0xa2c   :  { %v870_v32 = vpop.permute.xlu0 %869 }
 0xa2d   :  { %v872_v33 = vadd.f32 %v870_v32, %v862_v31 }
 0xa2f   :  { %1964 = vtanh.f32 %v872_v33 }
 0xa39   :  { %v1965_v35 = vpop.eup %1964 }
 0xa3a   :  { %875 = vrot.lane.b32.xlu0 %v1965_v35, %s2064_s2 }
 0xa43   :  { %v899_v40 = vpop.permute.xlu1 %898 }
 0xa44   :  { %v901_v41 = vadd.f32 %v899_v40, %v891_v39 }
 0xa46   :  { %1966 = vtanh.f32 %v901_v41 }
 0xa50   :  { %v1967_v42 = vpop.eup %1966 }
 0xa51   :  { %904 = vrot.lane.b32.xlu1 %v1967_v42, %s2064_s2 }
 0xaac   :  { %v876_v43 = vpop.permute.xlu0 %875 }
 0xaad   :  { %v878_v45 = vmul.f32 %v1959_v25, %v876_v43 }
 0xaaf   :  { %909 = vrot.lane.b32.xlu0 %v878_v45, %s2063_s6 }
 0xab3   :  { %914 = vrot.lane.b32.xlu0 %v872_v33, %s2065_s18 }
 0xac3   :  { %v905_v46 = vpop.permute.xlu1 %904 }
 0xac4   :  { %v2333_v49 = vmul.f32 %v1963_v27, %v905_v46 }
 0xac6   :  { %919 = vrot.lane.b32.xlu1 %v2333_v49, %s2063_s6 }
 0xaca   :  { %924 = vrot.lane.b32.xlu1 %v901_v41, %s2065_s18 }
 0xb21   :  { %v910_v54 = vpop.permute.xlu0 %909 }
 0xb22   :  { %912 = vst.msk [vmem:[#allocation3] sm:$0xff] %vm157_vm0, %v910_v54  ;;  %929 = vst.msk [vmem:[#allocation7 + $0x18] sm:$0xff] %vm157_vm0, %v910_v54 }
 0xb25   :  { %v915_v55 = vpop.permute.xlu0 %914 }
 0xb26   :  { %917 = vst.msk [vmem:[#allocation4] sm:$0xff] %vm157_vm0, %v915_v55 }
 0xb29   :  { %v937_v57 = vld [vmem:[#allocation3] sm:$0xff] }
 0xb2a   :  { %v938_v58 = vpack.c.bf16 %v937_v57, %v937_v57  ;;  %v2383_v57 = vld [vmem:[%s2531_s3] sm:$0xff]  }
 0xb2c   :  { %1829 = vmatmul.mubr.msk.bf16.vlgmr.msra.gmra.mrb[24].mxu0 %vm157_vm0, %v938_v58 }
 0xb2d   :  { %1841 = vmatpush3.bf16.msra.mxu0 %v2104_v4  ;;  %1844 = vmatprep.mubr.msk.bf16.mxu0 %vm2062_vm2, %v2060_v1  ;;  %v1029_v14 = vld [vmem:[#allocation4] sm:$0xff] }
 0xb2e   :  { %1842 = vmatprep.subr.bf16.mxu0 %v2060_v1 }
 0xb31   :  { %1843 = vmatpush3.bf16.msra.mxu0 %v2126_v8 }
 0xb32   :  { %1856 = vmatprep.subr.bf16.mxu0 %v2060_v1 }
 0xb38   :  { %v920_v60 = vpop.permute.xlu1 %919 }
 0xb39   :  { %922 = vst.msk [vmem:[#allocation5] sm:$0xff] %vm157_vm0, %v920_v60 }
 0xb3c   :  { %v925_v61 = vpop.permute.xlu1 %924 }
 0xb3d   :  { %927 = vst.msk [vmem:[#allocation6] sm:$0xff] %vm157_vm0, %v925_v61 }
 0xb40   :  { %v983_v63 = vld [vmem:[#allocation5] sm:$0xff] }
 0xb41   :  { %v984_v0 = vpack.c.bf16 %v983_v63, %v983_v63 }
 0xb43   :  { %1837 = vmatmul.mubr.msk.bf16.vlgmr.msra.gmra.mrb[24].mxu1 %vm157_vm0, %v984_v0 }
 0xb44   :  { %1849 = vmatpush3.bf16.msra.mxu1 %v2144_v13  ;;  %1852 = vmatprep.mubr.msk.bf16.mxu1 %vm2062_vm2, %v2060_v1 }
 0xb45   :  { %1850 = vmatprep.subr.bf16.mxu1 %v2060_v1 }
 0xb48   :  { %1851 = vmatpush3.bf16.msra.mxu1 %v2155_v16 }
 0xb49   :  { %1864 = vmatprep.subr.bf16.mxu1 %v2060_v1 }
 0xbff   :  { %v976_v4 = vpop.f32.mrb[24].mxu0 }
 0xc00   :  { %v982_v3 = vadd.f32 %v976_v4, %v2202_v56  ;;  %v1830_v6 = vpop.f32.mrb[25].mxu0  ;;  %v1058_v56 = vld [vmem:[#allocation6] sm:$0xff] }
 0xc01   :  { %v979_v9 = vpop.f32.mrb[26].mxu0 }
 0xc02   :  { %1968 = vtanh.f32 %v982_v3  ;;  %v1831_v11 = vpop.f32.mrb[27].mxu0  ;;  %v1698_v44 = vmul.f32 -1.442695, %v982_v3 }
 0xc0c   :  { %v1969_v12 = vpop.eup %1968 }
 0xc0d   :  { %1043 = vrot.lane.b32.xlu0 %v1969_v12, %s2064_s2 }
 0xc11   :  { %1038 = vrot.lane.b32.xlu0 %v1029_v14, %s2063_s6 }
 0xc16   :  { %v1022_v15 = vpop.f32.mrb[24].mxu1 }
 0xc17   :  { %v1028_v17 = vadd.f32 %v1022_v15, %v2200_v52  ;;  %v1838_v18 = vpop.f32.mrb[25].mxu1 }
 0xc18   :  { %v1025_v19 = vpop.f32.mrb[26].mxu1 }
 0xc19   :  { %1970 = vtanh.f32 %v1028_v17  ;;  %v1839_v36 = vpop.f32.mrb[27].mxu1  ;;  %v1699_v22 = vmul.f32 -1.442695, %v1028_v17 }
 0xc1a   :  { %1972 = vpow2.f32 %v1698_v44 }
 0xc23   :  { %v1971_v20 = vpop.eup %1970 }
 0xc24   :  { %1072 = vrot.lane.b32.xlu1 %v1971_v20, %s2064_s2  ;;  %v1973_v50 = vpop.eup %1972 }
 0xc25   :  { %v1033_v21 = vadd.f32 1.0, %v1973_v50 }
 0xc27   :  { %1974 = vrcp.f32 %v1033_v21 }
 0xc28   :  { %1067 = vrot.lane.b32.xlu1 %v1058_v56, %s2063_s6  ;;  %1976 = vpow2.f32 %v1699_v22 }
 0xc31   :  { %v1975_v23 = vpop.eup %1974 }
 0xc32   :  { %v1977_v25 = vpop.eup %1976 }
 0xc33   :  { %v1062_v7 = vadd.f32 1.0, %v1977_v25 }
 0xc35   :  { %1978 = vrcp.f32 %v1062_v7 }
 0xc3f   :  { %v1979_v59 = vpop.eup %1978 }
 0xc7f   :  { %v1044_v24 = vpop.permute.xlu0 %1043 }
 0xc80   :  { %v1046_v52 = vmul.f32 %v1975_v23, %v1044_v24 }
 0xc82   :  { %1048 = vrot.lane.b32.xlu0 %v1046_v52, %s2063_s6 }
 0xc83   :  { %v1039_v27 = vpop.permute.xlu0 %1038 }
 0xc84   :  { %v1041_v28 = vmul.f32 %v1975_v23, %v1039_v27 }
 0xc96   :  { %v1073_v2 = vpop.permute.xlu1 %1072 }
 0xc97   :  { %v1075_v26 = vmul.f32 %v1979_v59, %v1073_v2 }
 0xc99   :  { %1077 = vrot.lane.b32.xlu1 %v1075_v26, %s2063_s6 }
 0xc9a   :  { %v1068_v32 = vpop.permute.xlu1 %1067 }
 0xc9b   :  { %v1070_v33 = vmul.f32 %v1979_v59, %v1068_v32 }
 0xcf4   :  { %v1049_v29 = vpop.permute.xlu0 %1048 }
 0xcf5   :  { %v1051_v30 = vadd.f32 %v1049_v29, %v1041_v28 }
 0xcf7   :  { %1980 = vtanh.f32 %v1051_v30 }
 0xd01   :  { %v1981_v31 = vpop.eup %1980 }
 0xd02   :  { %1054 = vrot.lane.b32.xlu0 %v1981_v31, %s2064_s2 }
 0xd0b   :  { %v1078_v35 = vpop.permute.xlu1 %1077 }
 0xd0c   :  { %v1080_v37 = vadd.f32 %v1078_v35, %v1070_v33 }
 0xd0e   :  { %1982 = vtanh.f32 %v1080_v37 }
 0xd18   :  { %v1983_v39 = vpop.eup %1982 }
 0xd19   :  { %1083 = vrot.lane.b32.xlu1 %v1983_v39, %s2064_s2 }
 0xd74   :  { %v1055_v40 = vpop.permute.xlu0 %1054 }
 0xd75   :  { %v1057_v41 = vmul.f32 %v1975_v23, %v1055_v40 }
 0xd77   :  { %1088 = vrot.lane.b32.xlu0 %v1057_v41, %s2063_s6 }
 0xd7b   :  { %1093 = vrot.lane.b32.xlu0 %v1051_v30, %s2065_s18 }
 0xd8b   :  { %v1084_v42 = vpop.permute.xlu1 %1083 }
 0xd8c   :  { %v2369_v43 = vmul.f32 %v1979_v59, %v1084_v42  ;;  %v2033_v42 = vld [vmem:[%s2531_s3 + $0x8] sm:$0xff]  }
 0xd8e   :  { %1098 = vrot.lane.b32.xlu1 %v2369_v43, %s2063_s6 }
 0xd92   :  { %1103 = vrot.lane.b32.xlu1 %v1080_v37, %s2065_s18 }
 0xde9   :  { %v2374_v45 = vpop.permute.xlu0 %1088 }
 0xdea   :  { %1091 = vst.msk [vmem:[#allocation3] sm:$0xff] %vm157_vm0, %v2374_v45 }
 0xded   :  { %v1094_v46 = vpop.permute.xlu0 %1093 }
 0xdee   :  { %1096 = vst.msk [vmem:[#allocation4] sm:$0xff] %vm157_vm0, %v1094_v46 }
 0xdf1   :  { %v1114_v54 = vld [vmem:[#allocation3] sm:$0xff] }
 0xdf2   :  { %v1115_v55 = vpack.c.bf16 %v1114_v54, %v1114_v54 }
 0xdf4   :  { %1845 = vmatmul.mubr.msk.bf16.vlgmr.msra.gmra.mrb[28].mxu0 %vm157_vm0, %v1115_v55 }
 0xdf5   :  { %1857 = vmatpush3.bf16.msra.mxu0 %v2383_v57  ;;  %1860 = vmatprep.mubr.msk.bf16.mxu0 %vm2062_vm2, %v2060_v1 }
 0xdf6   :  { %1858 = vmatprep.subr.bf16.mxu0 %v2060_v1 }
 0xdf9   :  { %1859 = vmatpush3.bf16.msra.mxu0 %v2126_v8 }
 0xdfa   :  { %1872 = vmatprep.subr.bf16.mxu0 %v2060_v1 }
 0xe00   :  { %v1099_v58 = vpop.permute.xlu1 %1098 }
 0xe01   :  { %1101 = vst.msk [vmem:[#allocation5] sm:$0xff] %vm157_vm0, %v1099_v58 }
 0xe04   :  { %v1104_v60 = vpop.permute.xlu1 %1103 }
 0xe05   :  { %1106 = vst.msk [vmem:[#allocation6] sm:$0xff] %vm157_vm0, %v1104_v60  ;;  %v2035_v60 = vld [vmem:[%s2531_s3 + $0x18] sm:$0xff]  }
 0xe08   :  { %v1160_v61 = vld [vmem:[#allocation5] sm:$0xff] }
 0xe09   :  { %v1161_v63 = vpack.c.bf16 %v1160_v61, %v1160_v61 }
 0xe0b   :  { %1853 = vmatmul.mubr.msk.bf16.vlgmr.msra.gmra.mrb[28].mxu1 %vm157_vm0, %v1161_v63 }
 0xe0c   :  { %1865 = vmatpush3.bf16.msra.mxu1 %v2144_v13  ;;  %1868 = vmatprep.mubr.msk.bf16.mxu1 %vm2062_vm2, %v2060_v1  ;;  %v1206_v13 = vld [vmem:[#allocation4] sm:$0xff] }
 0xe0d   :  { %1866 = vmatprep.subr.bf16.mxu1 %v2060_v1 }
 0xe10   :  { %1867 = vmatpush3.bf16.msra.mxu1 %v2155_v16 }
 0xe11   :  { %1880 = vmatprep.subr.bf16.mxu1 %v2060_v1 }
 0xec7   :  { %v1153_v8 = vpop.f32.mrb[28].mxu0 }
 0xec8   :  { %v1159_v0 = vadd.f32 %v1153_v8, %v2206_v62  ;;  %v1846_v4 = vpop.f32.mrb[29].mxu0  ;;  %v1235_v62 = vld [vmem:[#allocation6] sm:$0xff] }
 0xec9   :  { %v1156_v3 = vpop.f32.mrb[30].mxu0 }
 0xeca   :  { %1984 = vtanh.f32 %v1159_v0  ;;  %v1847_v6 = vpop.f32.mrb[31].mxu0  ;;  %v1702_v18 = vmul.f32 -1.442695, %v1159_v0 }
 0xed4   :  { %v1985_v9 = vpop.eup %1984 }
 0xed5   :  { %1220 = vrot.lane.b32.xlu0 %v1985_v9, %s2064_s2 }
 0xed9   :  { %1215 = vrot.lane.b32.xlu0 %v1206_v13, %s2063_s6 }
 0xede   :  { %v1199_v11 = vpop.f32.mrb[28].mxu1 }
 0xedf   :  { %v1205_v12 = vadd.f32 %v1199_v11, %v2196_v47  ;;  %v1854_v14 = vpop.f32.mrb[29].mxu1 }
 0xee0   :  { %v1202_v16 = vpop.f32.mrb[30].mxu1 }
 0xee1   :  { %1986 = vtanh.f32 %v1205_v12  ;;  %v1855_v15 = vpop.f32.mrb[31].mxu1  ;;  %v1703_v20 = vmul.f32 -1.442695, %v1205_v12 }
 0xee2   :  { %1988 = vpow2.f32 %v1702_v18 }
 0xeeb   :  { %v1987_v17 = vpop.eup %1986 }
 0xeec   :  { %1249 = vrot.lane.b32.xlu1 %v1987_v17, %s2064_s2  ;;  %v1989_v19 = vpop.eup %1988 }
 0xeed   :  { %v1210_v36 = vadd.f32 1.0, %v1989_v19 }
 0xeef   :  { %1990 = vrcp.f32 %v1210_v36 }
 0xef0   :  { %1244 = vrot.lane.b32.xlu1 %v1235_v62, %s2063_s6  ;;  %1992 = vpow2.f32 %v1703_v20 }
 0xef9   :  { %v1991_v56 = vpop.eup %1990 }
 0xefa   :  { %v1993_v50 = vpop.eup %1992 }
 0xefb   :  { %v1239_v21 = vadd.f32 1.0, %v1993_v50 }
 0xefd   :  { %1994 = vrcp.f32 %v1239_v21 }
 0xf07   :  { %v1995_v22 = vpop.eup %1994 }
 0xf47   :  { %v1221_v44 = vpop.permute.xlu0 %1220 }
 0xf48   :  { %v1223_v47 = vmul.f32 %v1991_v56, %v1221_v44 }
 0xf4a   :  { %1225 = vrot.lane.b32.xlu0 %v1223_v47, %s2063_s6 }
 0xf4b   :  { %v1216_v52 = vpop.permute.xlu0 %1215 }
 0xf4c   :  { %v1218_v25 = vmul.f32 %v1991_v56, %v1216_v52 }
 0xf5e   :  { %v1250_v23 = vpop.permute.xlu1 %1249 }
 0xf5f   :  { %v1252_v24 = vmul.f32 %v1995_v22, %v1250_v23 }
 0xf61   :  { %1254 = vrot.lane.b32.xlu1 %v1252_v24, %s2063_s6 }
 0xf62   :  { %v1245_v26 = vpop.permute.xlu1 %1244 }
 0xf63   :  { %v1247_v27 = vmul.f32 %v1995_v22, %v1245_v26 }
 0xfbc   :  { %v1226_v7 = vpop.permute.xlu0 %1225 }
 0xfbd   :  { %v1228_v59 = vadd.f32 %v1226_v7, %v1218_v25 }
 0xfbf   :  { %1996 = vtanh.f32 %v1228_v59 }
 0xfc9   :  { %v1997_v2 = vpop.eup %1996 }
 0xfca   :  { %1231 = vrot.lane.b32.xlu0 %v1997_v2, %s2064_s2 }
 0xfd3   :  { %v1255_v28 = vpop.permute.xlu1 %1254 }
 0xfd4   :  { %v1257_v29 = vadd.f32 %v1255_v28, %v1247_v27 }
 0xfd6   :  { %1998 = vtanh.f32 %v1257_v29 }
 0xfe0   :  { %v1999_v30 = vpop.eup %1998 }
 0xfe1   :  { %1260 = vrot.lane.b32.xlu1 %v1999_v30, %s2064_s2 }
0x103c   :  { %v1232_v31 = vpop.permute.xlu0 %1231 }
0x103d   :  { %v1234_v32 = vmul.f32 %v1991_v56, %v1232_v31 }
0x103f   :  { %1265 = vrot.lane.b32.xlu0 %v1234_v32, %s2063_s6 }
0x1043   :  { %1270 = vrot.lane.b32.xlu0 %v1228_v59, %s2065_s18 }
0x1053   :  { %v1261_v33 = vpop.permute.xlu1 %1260 }
0x1054   :  { %v2412_v35 = vmul.f32 %v1995_v22, %v1261_v33 }
0x1056   :  { %1275 = vrot.lane.b32.xlu1 %v2412_v35, %s2063_s6 }
0x105a   :  { %1280 = vrot.lane.b32.xlu1 %v1257_v29, %s2065_s18 }
0x10b1   :  { %v2417_v37 = vpop.permute.xlu0 %1265 }
0x10b2   :  { %1268 = vst.msk [vmem:[#allocation3] sm:$0xff] %vm157_vm0, %v2417_v37 }
0x10b5   :  { %v1271_v39 = vpop.permute.xlu0 %1270 }
0x10b6   :  { %1273 = vst.msk [vmem:[#allocation4] sm:$0xff] %vm157_vm0, %v1271_v39 }
0x10b9   :  { %v1291_v40 = vld [vmem:[#allocation3] sm:$0xff] }
0x10ba   :  { %v1292_v41 = vpack.c.bf16 %v1291_v40, %v1291_v40 }
0x10bc   :  { %1861 = vmatmul.mubr.msk.bf16.vlgmr.msra.gmra.mrb[32].mxu0 %vm157_vm0, %v1292_v41 }
0x10bd   :  { %1873 = vmatpush3.bf16.msra.mxu0 %v2383_v57  ;;  %1876 = vmatprep.mubr.msk.bf16.mxu0 %vm2062_vm2, %v2060_v1  ;;  %v2034_v57 = vld [vmem:[%s2531_s3 + $0x10] sm:$0xff]   ;;  %v1383_v6 = vld [vmem:[#allocation4] sm:$0xff]  ;;  %s2066_s3 = smov [#allocation7]  }
0x10be   :  { %1874 = vmatprep.subr.bf16.mxu0 %v2060_v1  ;;  %s1648_s26 = sshll.u32 %s2066_s3, 4  ;;  %s1649_s26 = int_to_ptr.vmem [resolvable:$true] %s1648_s26 }
0x10bf   :  { %s2036_s27 = scalar_lea.vmem %s1649_s26, 1024  ;;  %p2041_p1 = scmp.lt.s32.totalorder %s1649_s26, %s1649_s26 }
0x10c0   :  { %p2037_p0 = scmp.ne.s32.totalorder %s1649_s26, %s2036_s27  ;;  %p2042_p2 = scmp.lt.s32.totalorder %s2036_s27, %s2036_s27 }
0x10c1   :  { %1875 = vmatpush3.bf16.msra.mxu0 %v2033_v42 }
0x10c2   :  { %p2043_p3 = por %p2042_p2, %p2041_p1 }
0x10c4   :  { %p2044_p4 = pnand %p2043_p3, %p2037_p0 }
0x10c8   :  { %v1276_v46 = vpop.permute.xlu1 %1275 }
0x10c9   :  { %1278 = vst.msk [vmem:[#allocation5] sm:$0xff] %vm157_vm0, %v1276_v46 }
0x10cc   :  { %v1281_v54 = vpop.permute.xlu1 %1280 }
0x10cd   :  { %1283 = vst.msk [vmem:[#allocation6] sm:$0xff] %vm157_vm0, %v1281_v54 }
0x10d0   :  { %v1337_v55 = vld [vmem:[#allocation5] sm:$0xff] }
0x10d1   :  { %v1338_v58 = vpack.c.bf16 %v1337_v55, %v1337_v55 }
0x10d3   :  { %1869 = vmatmul.mubr.msk.bf16.vlgmr.msra.gmra.mrb[32].mxu1 %vm157_vm0, %v1338_v58 }
0x10d4   :  { %1881 = vmatpush3.bf16.msra.mxu1 %v2034_v57  ;;  %1884 = vmatprep.mubr.msk.bf16.mxu1 %vm2062_vm2, %v2060_v1 }
0x10d5   :  { %1882 = vmatprep.subr.bf16.mxu1 %v2060_v1 }
0x10d8   :  { %1883 = vmatpush3.bf16.msra.mxu1 %v2035_v60 }
0x118f   :  { %v1330_v61 = vpop.f32.mrb[32].mxu0 }
0x1190   :  { %v1336_v63 = vadd.f32 %v1330_v61, %v2211_v5  ;;  %v1862_v8 = vpop.f32.mrb[33].mxu0  ;;  %v1412_v5 = vld [vmem:[#allocation6] sm:$0xff] }
0x1191   :  { %v1333_v0 = vpop.f32.mrb[34].mxu0 }
0x1192   :  { %2000 = vtanh.f32 %v1336_v63  ;;  %v1863_v4 = vpop.f32.mrb[35].mxu0  ;;  %v1706_v16 = vmul.f32 -1.442695, %v1336_v63 }
0x119c   :  { %v2001_v3 = vpop.eup %2000 }
0x119d   :  { %1397 = vrot.lane.b32.xlu0 %v2001_v3, %s2064_s2 }
0x11a1   :  { %1392 = vrot.lane.b32.xlu0 %v1383_v6, %s2063_s6 }
0x11a6   :  { %v1376_v9 = vpop.f32.mrb[32].mxu1 }
0x11a7   :  { %v1382_v1 = vadd.f32 %v1376_v9, %v2192_v38  ;;  %v1870_v13 = vpop.f32.mrb[33].mxu1 }
0x11a8   :  { %v1379_v11 = vpop.f32.mrb[34].mxu1 }
0x11a9   :  { %2002 = vtanh.f32 %v1382_v1  ;;  %v1871_v12 = vpop.f32.mrb[35].mxu1  ;;  %v1707_v62 = vmul.f32 -1.442695, %v1382_v1 }
0x11aa   :  { %2004 = vpow2.f32 %v1706_v16 }
0x11b3   :  { %v2003_v14 = vpop.eup %2002 }
0x11b4   :  { %1426 = vrot.lane.b32.xlu1 %v2003_v14, %s2064_s2  ;;  %v2005_v15 = vpop.eup %2004 }
0x11b5   :  { %v1387_v17 = vadd.f32 1.0, %v2005_v15 }
0x11b7   :  { %2006 = vrcp.f32 %v1387_v17 }
0x11b8   :  { %1421 = vrot.lane.b32.xlu1 %v1412_v5, %s2063_s6  ;;  %2008 = vpow2.f32 %v1707_v62 }
0x11c1   :  { %v2007_v18 = vpop.eup %2006 }
0x11c2   :  { %v2009_v36 = vpop.eup %2008 }
0x11c3   :  { %v1416_v20 = vadd.f32 1.0, %v2009_v36 }
0x11c5   :  { %2010 = vrcp.f32 %v1416_v20 }
0x11cf   :  { %v2011_v56 = vpop.eup %2010 }
0x120f   :  { %v1398_v19 = vpop.permute.xlu0 %1397 }
0x1210   :  { %v1400_v38 = vmul.f32 %v2007_v18, %v1398_v19 }
0x1212   :  { %1402 = vrot.lane.b32.xlu0 %v1400_v38, %s2063_s6 }
0x1213   :  { %v1393_v50 = vpop.permute.xlu0 %1392 }
0x1214   :  { %v1395_v21 = vmul.f32 %v2007_v18, %v1393_v50 }
0x1226   :  { %v1427_v44 = vpop.permute.xlu1 %1426 }
0x1227   :  { %v1429_v47 = vmul.f32 %v2011_v56, %v1427_v44 }
0x1229   :  { %1431 = vrot.lane.b32.xlu1 %v1429_v47, %s2063_s6 }
0x122a   :  { %v1422_v52 = vpop.permute.xlu1 %1421 }
0x122b   :  { %v1424_v25 = vmul.f32 %v2011_v56, %v1422_v52 }
0x1284   :  { %v1403_v22 = vpop.permute.xlu0 %1402 }
0x1285   :  { %v1405_v23 = vadd.f32 %v1403_v22, %v1395_v21 }
0x1287   :  { %2012 = vtanh.f32 %v1405_v23 }
0x1291   :  { %v2013_v24 = vpop.eup %2012 }
0x1292   :  { %1408 = vrot.lane.b32.xlu0 %v2013_v24, %s2064_s2 }
0x129b   :  { %v1432_v7 = vpop.permute.xlu1 %1431 }
0x129c   :  { %v1434_v59 = vadd.f32 %v1432_v7, %v1424_v25 }
0x129e   :  { %2014 = vtanh.f32 %v1434_v59 }
0x12a8   :  { %v2015_v2 = vpop.eup %2014 }
0x12a9   :  { %1437 = vrot.lane.b32.xlu1 %v2015_v2, %s2064_s2 }
0x1304   :  { %v1409_v26 = vpop.permute.xlu0 %1408 }
0x1305   :  { %v1411_v27 = vmul.f32 %v2007_v18, %v1409_v26 }
0x1307   :  { %1442 = vrot.lane.b32.xlu0 %v1411_v27, %s2063_s6 }
0x130b   :  { %1447 = vrot.lane.b32.xlu0 %v1405_v23, %s2065_s18 }
0x131b   :  { %v1438_v28 = vpop.permute.xlu1 %1437 }
0x131c   :  { %v2454_v29 = vmul.f32 %v2011_v56, %v1438_v28 }
0x131e   :  { %1452 = vrot.lane.b32.xlu1 %v2454_v29, %s2063_s6 }
0x1322   :  { %1457 = vrot.lane.b32.xlu1 %v1434_v59, %s2065_s18 }
0x1379   :  { %v2459_v30 = vpop.permute.xlu0 %1442 }
0x137a   :  { %1445 = vst.msk [vmem:[#allocation3] sm:$0xff] %vm157_vm0, %v2459_v30 }
0x137d   :  { %v1448_v31 = vpop.permute.xlu0 %1447 }
0x137e   :  { %1450 = vst.msk [vmem:[#allocation4] sm:$0xff] %vm157_vm0, %v1448_v31 }
0x1381   :  { %v1468_v32 = vld [vmem:[#allocation3] sm:$0xff] }
0x1382   :  { %v1469_v33 = vpack.c.bf16 %v1468_v32, %v1468_v32 }
0x1384   :  { %1877 = vmatmul.mubr.msk.bf16.vlgmr.msra.gmra.mrb[36].mxu0 %vm157_vm0, %v1469_v33 }
0x1385   :  { %v1560_v61 = vld [vmem:[#allocation4] sm:$0xff] }
0x1390   :  { %v1453_v39 = vpop.permute.xlu1 %1452 }
0x1391   :  { %1455 = vst.msk [vmem:[#allocation5] sm:$0xff] %vm157_vm0, %v1453_v39 }
0x1394   :  { %v1458_v40 = vpop.permute.xlu1 %1457 }
0x1395   :  { %1460 = vst.msk [vmem:[#allocation6] sm:$0xff] %vm157_vm0, %v1458_v40 }
0x1398   :  { %v1514_v41 = vld [vmem:[#allocation5] sm:$0xff] }
0x1399   :  { %v1515_v42 = vpack.c.bf16 %v1514_v41, %v1514_v41 }
0x139b   :  { %1885 = vmatmul.mubr.msk.bf16.vlgmr.msra.gmra.mrb[36].mxu1 %vm157_vm0, %v1515_v42 }
0x1457   :  { %v1507_v46 = vpop.f32.mrb[36].mxu0 }
0x1458   :  { %v1513_v54 = vadd.f32 %v1507_v46, %v2215_v10  ;;  %v1878_v55 = vpop.f32.mrb[37].mxu0  ;;  %v1589_v10 = vld [vmem:[#allocation6] sm:$0xff] }
0x1459   :  { %v1510_v58 = vpop.f32.mrb[38].mxu0 }
0x145a   :  { %2016 = vtanh.f32 %v1513_v54  ;;  %v1879_v57 = vpop.f32.mrb[39].mxu0  ;;  %v1710_v9 = vmul.f32 -1.442695, %v1513_v54 }
0x1464   :  { %v2017_v60 = vpop.eup %2016 }
0x1465   :  { %1574 = vrot.lane.b32.xlu0 %v2017_v60, %s2064_s2 }
0x1469   :  { %1569 = vrot.lane.b32.xlu0 %v1560_v61, %s2063_s6 }
0x146e   :  { %v1553_v63 = vpop.f32.mrb[36].mxu1 }
0x146f   :  { %v1559_v8 = vadd.f32 %v1553_v63, %v2188_v34  ;;  %v1886_v0 = vpop.f32.mrb[37].mxu1 }
0x1470   :  { %v1556_v4 = vpop.f32.mrb[38].mxu1 }
0x1471   :  { %2018 = vtanh.f32 %v1559_v8  ;;  %v1887_v3 = vpop.f32.mrb[39].mxu1  ;;  %v1711_v11 = vmul.f32 -1.442695, %v1559_v8 }
0x1472   :  { %2020 = vpow2.f32 %v1710_v9 }
0x147b   :  { %v2019_v6 = vpop.eup %2018 }
0x147c   :  { %1603 = vrot.lane.b32.xlu1 %v2019_v6, %s2064_s2  ;;  %v2021_v1 = vpop.eup %2020 }
0x147d   :  { %v1564_v13 = vadd.f32 1.0, %v2021_v1 }
0x147f   :  { %2022 = vrcp.f32 %v1564_v13 }
0x1480   :  { %1598 = vrot.lane.b32.xlu1 %v1589_v10, %s2063_s6  ;;  %2024 = vpow2.f32 %v1711_v11 }
0x1489   :  { %v2023_v12 = vpop.eup %2022 }
0x148a   :  { %v2025_v5 = vpop.eup %2024 }
0x148b   :  { %v1593_v16 = vadd.f32 1.0, %v2025_v5 }
0x148d   :  { %2026 = vrcp.f32 %v1593_v16 }
0x1497   :  { %v2027_v15 = vpop.eup %2026 }
0x14d7   :  { %v1575_v14 = vpop.permute.xlu0 %1574 }
0x14d8   :  { %v1577_v34 = vmul.f32 %v2023_v12, %v1575_v14 }
0x14da   :  { %1579 = vrot.lane.b32.xlu0 %v1577_v34, %s2063_s6 }
0x14db   :  { %v1570_v18 = vpop.permute.xlu0 %1569 }
0x14dc   :  { %v1572_v19 = vmul.f32 %v2023_v12, %v1570_v18 }
0x14ee   :  { %v1604_v17 = vpop.permute.xlu1 %1603 }
0x14ef   :  { %v1606_v62 = vmul.f32 %v2027_v15, %v1604_v17 }
0x14f1   :  { %1608 = vrot.lane.b32.xlu1 %v1606_v62, %s2063_s6 }
0x14f2   :  { %v1599_v56 = vpop.permute.xlu1 %1598 }
0x14f3   :  { %v1601_v44 = vmul.f32 %v2027_v15, %v1599_v56 }
0x154c   :  { %v1580_v38 = vpop.permute.xlu0 %1579 }
0x154d   :  { %v1582_v36 = vadd.f32 %v1580_v38, %v1572_v19 }
0x154f   :  { %2028 = vtanh.f32 %v1582_v36 }
0x1559   :  { %v2029_v20 = vpop.eup %2028 }
0x155a   :  { %1585 = vrot.lane.b32.xlu0 %v2029_v20, %s2064_s2 }
0x155e   :  { %374 = vrot.lane.b32.xlu0 %v2225_v48, %s2064_s2 }
0x1562   :  { %745 = vrot.lane.b32.xlu0 %v2297_v53, %s2064_s2 }
0x1563   :  { %v1609_v47 = vpop.permute.xlu1 %1608 }
0x1564   :  { %v1611_v50 = vadd.f32 %v1609_v47, %v1601_v44 }
0x1566   :  { %2030 = vtanh.f32 %v1611_v50  ;;  %1108 = vrot.lane.b32.xlu0 %v2369_v43, %s2064_s2 }
0x156a   :  { %1462 = vrot.lane.b32.xlu0 %v2454_v29, %s2064_s2 }
0x1570   :  { %v2031_v21 = vpop.eup %2030 }
0x1571   :  { %1614 = vrot.lane.b32.xlu1 %v2031_v21, %s2064_s2 }
0x1575   :  { %560 = vrot.lane.b32.xlu1 %v2261_v51, %s2064_s2 }
0x1579   :  { %930 = vrot.lane.b32.xlu1 %v2333_v49, %s2064_s2 }
0x157d   :  { %1285 = vrot.lane.b32.xlu1 %v2412_v35, %s2064_s2 }
0x1581   :  { %1624 = vrot.lane.b32.xlu1 %v1582_v36, %s2065_s18 }
0x15cc   :  { %v1586_v48 = vpop.permute.xlu0 %1585 }
0x15cd   :  { %v1588_v53 = vmul.f32 %v2023_v12, %v1586_v48 }
0x15cf   :  { %1619 = vrot.lane.b32.xlu1 %v1588_v53, %s2063_s6 }
0x15d0   :  { %v375_v43 = vpop.permute.xlu0 %374 }
0x15d1   :  { %379 = vst.msk [vmem:[#allocation7 + $0x38] sm:$0xff] %vm378_vm3, %v375_v43 }
0x15d3   :  { %1634 = vrot.lane.b32.xlu1 %v1611_v50, %s2065_s18 }
0x15d4   :  { %v746_v22 = vpop.permute.xlu0 %745 }
0x15d5   :  { %749 = vst.msk [vmem:[#allocation7 + $0x28] sm:$0xff] %vm378_vm3, %v746_v22 }
0x15d6   :  { %1284 = vst.msk [vmem:[#allocation7 + $0x28] sm:$0xff] %vm157_vm0, %v2417_v37 }
0x15d8   :  { %v1109_v51 = vpop.permute.xlu0 %1108 }
0x15d9   :  { %1111 = vst.msk [vmem:[#allocation7 + $0x18] sm:$0xff] %vm378_vm3, %v1109_v51 }
0x15dc   :  { %v1463_v49 = vpop.permute.xlu0 %1462 }
0x15dd   :  { %1465 = vst.msk [vmem:[#allocation7 + $0x8] sm:$0xff] %vm378_vm3, %v1463_v49 }
0x15e3   :  { %v1615_v35 = vpop.permute.xlu1 %1614 }
0x15e4   :  { %v1617_v23 = vmul.f32 %v2027_v15, %v1615_v35 }
0x15e6   :  { %1639 = vrot.lane.b32.xlu0 %v1617_v23, %s2064_s2 }
0x15e7   :  { %v561_v24 = vpop.permute.xlu1 %560 }
0x15e8   :  { %564 = vst.msk [vmem:[#allocation7 + $0x30] sm:$0xff] %vm378_vm3, %v561_v24 }
0x15e9   :  { %1461 = vst.msk [vmem:[#allocation7 + $0x30] sm:$0xff] %vm157_vm0, %v2459_v30 }
0x15ea   :  { %1629 = vrot.lane.b32.xlu0 %v1617_v23, %s2063_s6 }
0x15eb   :  { %v931_v52 = vpop.permute.xlu1 %930 }
0x15ec   :  { %934 = vst.msk [vmem:[#allocation7 + $0x20] sm:$0xff] %vm378_vm3, %v931_v52 }
0x15ed   :  { %1107 = vst.msk [vmem:[#allocation7 + $0x20] sm:$0xff] %vm157_vm0, %v2374_v45 }
0x15ef   :  { %v1286_v37 = vpop.permute.xlu1 %1285 }
0x15f0   :  { %1288 = vst.msk [vmem:[#allocation7 + $0x10] sm:$0xff] %vm378_vm3, %v1286_v37 }
0x15f3   :  { %v1625_v25 = vpop.permute.xlu1 %1624 }
0x15f4   :  { %1627 = vst.msk [vmem:[#allocation4] sm:$0xff] %vm157_vm0, %v1625_v25 }
0x1641   :  { %v1620_v7 = vpop.permute.xlu1 %1619 }
0x1642   :  { %1622 = vst.msk [vmem:[#allocation3] sm:$0xff] %vm157_vm0, %v1620_v7  ;;  %1638 = vst.msk [vmem:[#allocation7 + $0x38] sm:$0xff] %vm157_vm0, %v1620_v7 }
0x1645   :  { %v1635_v59 = vpop.permute.xlu1 %1634 }
0x1646   :  { %1637 = vst.msk [vmem:[#allocation6] sm:$0xff] %vm157_vm0, %v1635_v59 }
0x1658   :  { %v1640_v2 = vpop.permute.xlu0 %1639 }
0x1659   :  { %1642 = vst.msk [vmem:[#allocation7] sm:$0xff] %vm378_vm3, %v1640_v2 }
0x165a   :  { %2047 = shalt.err (!%p2044_p4)
}
0x165b   :  { %s2048_s30 = scalar_lea.hbm %s2532_s4, 1024 }
0x165c   :  { %p2049_p5 = scmp.ne.s32.totalorder %s2532_s4, %s2048_s30  ;;  %p2052_p6 = scmp.lt.u32.totalorder %s2048_s30, %s2532_s4 }
0x165e   :  { %p2054_p7 = pnand %p2052_p6, %p2049_p5 }
0x1660   :  { %2057 = shalt.err (!%p2054_p7)
}
0x1661   :  { %s2067_s9 = smov 128   ;;  %s2068_s10 = smov 8   ;;  %v1630_v45 = vpop.permute.xlu0 %1629 }
0x1662   :  { %1654 = dma.vmem_to_hbm [thread:$0]  %s1649_s26, 1024, %s2532_s4, [#allocation8], %s2067_s9, %s2067_s9, %s2068_s10   ;;  %1632 = vst.msk [vmem:[#allocation5] sm:$0xff] %vm157_vm0, %v1630_v45 }
0x1663   :  { %2058 = dma.done.wait [#allocation8], 1024  }
0x1664   :  { %2059 = vsyncadd [#allocation8], 4294966272 }
0x1665   :  { %1658 = vsyncpa [#allocation8], 1 }

</bundles_post_ra>
